<compile_context>
chip_gen: v5e
topology: v5e:2x2
jax: 0.10.0
libtpu: 0.0.40
codegen_flags: <defaults>
</compile_context>

<pallas_src>
import jax
import jax.numpy as jnp
from jax.experimental import pallas as pl
from jax.experimental.pallas import tpu as pltpu

# Model dims (module defaults; small input_dim for the demo)
INPUT_DIM = 32
H1, H2, H3, H4 = 1024, 512, 256, 64
OUT_DIM = 4
PAD_OUT = 128  # lane-dense padded output width


def _mish_f32(x):
    # mish(x) = x * tanh(softplus(x)) = x * ((1+e^x)^2 - 1) / ((1+e^x)^2 + 1)
    # Single exp + one approximate reciprocal (EUP).  Clamp the exp argument:
    # for x > 20 the ratio is 1.0 to f32 precision, so the clamp is exact there
    # and avoids overflow of e^x.
    e = jnp.exp(jnp.minimum(x, 20.0))
    t = (1.0 + e) * (1.0 + e)
    return x * ((t - 1.0) * pl.reciprocal(t + 1.0, approx=True))


def mlp_kernel(x_ref,
               w1_ref, b1_ref,
               w2_ref, b2_ref,
               w3_ref, b3_ref,
               w4_ref, b4_ref,
               w5_ref, b5_ref,
               o_ref):
    def dense(h_f32, w_ref, b_ref):
        # bf16 operands on the MXU, f32 accumulation, f32 bias add.
        return jnp.dot(h_f32.astype(jnp.bfloat16), w_ref[...],
                       preferred_element_type=jnp.float32) + b_ref[...]

    h = x_ref[...].astype(jnp.float32)
    h = _mish_f32(dense(h, w1_ref, b1_ref))
    h = _mish_f32(dense(h, w2_ref, b2_ref))
    h = _mish_f32(dense(h, w3_ref, b3_ref))
    h = _mish_f32(dense(h, w4_ref, b4_ref))
    # Final layer: weight/bias already zero-padded to PAD_OUT lanes -> lane-dense store.
    o_ref[...] = dense(h, w5_ref, b5_ref).astype(o_ref.dtype)


def regression_net_forward(x, params, *, tile_m=None):
    """x: (B, INPUT_DIM) float32. params: list of (W_in_out f32, b f32) per layer."""
    B, D = x.shape
    assert D == INPUT_DIM

    if tile_m is None:
        # Cap the row tile: big enough to amortize per-step overhead, small enough
        # to keep activations comfortably in VMEM and (on v7x) give the parallel
        # batch axis >=2 steps for large batches.
        tile_m = B if B <= 256 else 256
    assert B % tile_m == 0, "batch must be divisible by tile_m"

    (w1, b1), (w2, b2), (w3, b3), (w4, b4), (w5, b5) = params

    # bf16 weights for the MXU (halves resident footprint too).
    w1b, w2b, w3b, w4b = (w.astype(jnp.bfloat16) for w in (w1, w2, w3, w4))
    # Pad the last layer to a lane-dense (64, 128) / (1, 128) so the output store
    # is full-width; extra columns are zero.
    w5b = jnp.pad(w5, ((0, 0), (0, PAD_OUT - OUT_DIM))).astype(jnp.bfloat16)
    b5p = jnp.pad(b5, (0, PAD_OUT - OUT_DIM)).reshape(1, PAD_OUT).astype(jnp.float32)

    # Biases as (1, H) f32 rows for clean 2-D VMEM layout / broadcasting.
    b1r, b2r, b3r, b4r = (b.reshape(1, -1).astype(jnp.float32)
                          for b in (b1, b2, b3, b4))

    def full_spec(shape):
        # Grid-invariant block: full array, constant index_map (no re-DMA per step).
        return pl.BlockSpec(shape, lambda i: (0, 0))

    grid = (B // tile_m,)

    out_padded = pl.pallas_call(
        mlp_kernel,
        out_shape=jax.ShapeDtypeStruct((B, PAD_OUT), jnp.float32),
        grid_spec=pltpu.PrefetchScalarGridSpec(
            num_scalar_prefetch=0,
            grid=grid,
            in_specs=[
                pl.BlockSpec((tile_m, D), lambda i: (i, 0)),   # x tile
                full_spec(w1b.shape), full_spec(b1r.shape),
                full_spec(w2b.shape), full_spec(b2r.shape),
                full_spec(w3b.shape), full_spec(b3r.shape),
                full_spec(w4b.shape), full_spec(b4r.shape),
                full_spec(w5b.shape), full_spec(b5p.shape),
            ],
            out_specs=pl.BlockSpec((tile_m, PAD_OUT), lambda i: (i, 0)),
        ),
        compiler_params=pltpu.CompilerParams(
            dimension_semantics=("parallel",),
            # Actual need is < 8 MiB at tile_m=256; 48 MiB leaves headroom and
            # stays below v7x's 64 MiB physical per-TC VMEM.
            vmem_limit_bytes=48 << 20,
        ),
    )(x, w1b, b1r, w2b, b2r, w3b, b3r, w4b, b4r, w5b, b5p)

    return out_padded[:, :OUT_DIM]


def init_params(key):
    """Deterministic init mimicking nn.Linear's U(-1/sqrt(fan_in), +1/sqrt(fan_in))."""
    dims = [(INPUT_DIM, H1), (H1, H2), (H2, H3), (H3, H4), (H4, OUT_DIM)]
    params = []
    for (fan_in, fan_out) in dims:
        key, kw, kb = jax.random.split(key, 3)
        bound = 1.0 / jnp.sqrt(fan_in)
        # stored as (in, out) so kernel does x @ W
        w = jax.random.uniform(kw, (fan_in, fan_out), jnp.float32,
                               minval=-bound, maxval=bound)
        b = jax.random.uniform(kb, (fan_out,), jnp.float32,
                               minval=-bound, maxval=bound)
        params.append((w, b))
    return params


def reference_forward(x, params):
    """Numerics-matched reference: bf16 dot operands, f32 accumulation, exact Mish."""
    h = x
    for i, (w, b) in enumerate(params):
        h = jnp.dot(h.astype(jnp.bfloat16), w.astype(jnp.bfloat16),
                    preferred_element_type=jnp.float32) + b
        if i < len(params) - 1:
            sp = jnp.maximum(h, 0.0) + jnp.log1p(jnp.exp(-jnp.abs(h)))
            h = h * jnp.tanh(sp)
    return h


if __name__ == "__main__":
    key = jax.random.PRNGKey(0)
    key, kx = jax.random.split(key)

    B = 8
    x = jax.random.normal(kx, (B, INPUT_DIM), jnp.float32)
    params = init_params(key)

    out = regression_net_forward(x, params)
    out = jax.block_until_ready(out)

    ref = reference_forward(x, params)
    assert out.shape == (B, OUT_DIM)
    assert jnp.allclose(out, ref, atol=1e-2, rtol=1e-2), \
        f"max err {jnp.max(jnp.abs(out - ref))}"

    print("KERNEL_OK")
</pallas_src>

<mosaic_0001>
module attributes {stable_mosaic.version = 11 : i64} {
  func.func @mlp_kernel(%arg0: i32, %arg1: memref<8x32xf32, #tpu.memory_space<vmem>>, %arg2: memref<32x1024xbf16, #tpu.memory_space<vmem>>, %arg3: memref<1x1024xf32, #tpu.memory_space<vmem>>, %arg4: memref<1024x512xbf16, #tpu.memory_space<vmem>>, %arg5: memref<1x512xf32, #tpu.memory_space<vmem>>, %arg6: memref<512x256xbf16, #tpu.memory_space<vmem>>, %arg7: memref<1x256xf32, #tpu.memory_space<vmem>>, %arg8: memref<256x64xbf16, #tpu.memory_space<vmem>>, %arg9: memref<1x64xf32, #tpu.memory_space<vmem>>, %arg10: memref<64x128xbf16, #tpu.memory_space<vmem>>, %arg11: memref<1x128xf32, #tpu.memory_space<vmem>>, %arg12: memref<8x128xf32, #tpu.memory_space<vmem>>) attributes {dimension_semantics = [#tpu.dimension_semantics<parallel>], iteration_bounds = array<i64: 1>, scalar_prefetch = 0 : i64, scratch_operands = 0 : i64, tpu.core_type = #tpu.core_type<tc>, window_params = [{transform_indices = @transform_0, window_bounds = array<i64: 8, 32>}, {pipeline_mode = #tpu.pipeline_mode<synchronous>, transform_indices = @transform_1, window_bounds = array<i64: 32, 1024>}, {pipeline_mode = #tpu.pipeline_mode<synchronous>, transform_indices = @transform_2, window_bounds = array<i64: 1, 1024>}, {pipeline_mode = #tpu.pipeline_mode<synchronous>, transform_indices = @transform_3, window_bounds = array<i64: 1024, 512>}, {pipeline_mode = #tpu.pipeline_mode<synchronous>, transform_indices = @transform_4, window_bounds = array<i64: 1, 512>}, {pipeline_mode = #tpu.pipeline_mode<synchronous>, transform_indices = @transform_5, window_bounds = array<i64: 512, 256>}, {pipeline_mode = #tpu.pipeline_mode<synchronous>, transform_indices = @transform_6, window_bounds = array<i64: 1, 256>}, {pipeline_mode = #tpu.pipeline_mode<synchronous>, transform_indices = @transform_7, window_bounds = array<i64: 256, 64>}, {pipeline_mode = #tpu.pipeline_mode<synchronous>, transform_indices = @transform_8, window_bounds = array<i64: 1, 64>}, {pipeline_mode = #tpu.pipeline_mode<synchronous>, transform_indices = @transform_9, window_bounds = array<i64: 64, 128>}, {pipeline_mode = #tpu.pipeline_mode<synchronous>, transform_indices = @transform_10, window_bounds = array<i64: 1, 128>}, {transform_indices = @transform_11, window_bounds = array<i64: 8, 128>}]} {
    %c0 = arith.constant 0 : index
    %c0_0 = arith.constant 0 : index
    %0 = vector.load %arg1[%c0, %c0_0] : memref<8x32xf32, #tpu.memory_space<vmem>>, vector<8x32xf32>
    %1 = arith.truncf %0 : vector<8x32xf32> to vector<8x32xbf16>
    %c0_1 = arith.constant 0 : index
    %c0_2 = arith.constant 0 : index
    %2 = vector.load %arg2[%c0_1, %c0_2] : memref<32x1024xbf16, #tpu.memory_space<vmem>>, vector<32x1024xbf16>
    %cst = arith.constant dense<0.000000e+00> : vector<8x1024xf32>
    %3 = tpu.matmul %1, %2, %cst {dimension_numbers = #tpu.dot_dimension_numbers<[1], [0], [0], [1], [0, 0, 1, 1], [], []>} : vector<8x32xbf16>, vector<32x1024xbf16>, vector<8x1024xf32> -> vector<8x1024xf32>
    %c0_3 = arith.constant 0 : index
    %c0_4 = arith.constant 0 : index
    %4 = vector.load %arg3[%c0_3, %c0_4] : memref<1x1024xf32, #tpu.memory_space<vmem>>, vector<1x1024xf32>
    %5 = vector.broadcast %4 : vector<1x1024xf32> to vector<8x1024xf32>
    %6 = arith.addf %3, %5 : vector<8x1024xf32>
    %cst_5 = arith.constant 2.000000e+01 : f32
    %7 = vector.broadcast %cst_5 : f32 to vector<8x1024xf32>
    %8 = arith.minimumf %6, %7 : vector<8x1024xf32>
    %9 = math.exp %8 : vector<8x1024xf32>
    %cst_6 = arith.constant 1.000000e+00 : f32
    %10 = vector.broadcast %cst_6 : f32 to vector<8x1024xf32>
    %11 = arith.addf %10, %9 : vector<8x1024xf32>
    %cst_7 = arith.constant 1.000000e+00 : f32
    %12 = vector.broadcast %cst_7 : f32 to vector<8x1024xf32>
    %13 = arith.addf %12, %9 : vector<8x1024xf32>
    %14 = arith.mulf %11, %13 : vector<8x1024xf32>
    %cst_8 = arith.constant 1.000000e+00 : f32
    %15 = vector.broadcast %cst_8 : f32 to vector<8x1024xf32>
    %16 = arith.subf %14, %15 : vector<8x1024xf32>
    %cst_9 = arith.constant 1.000000e+00 : f32
    %17 = vector.broadcast %cst_9 : f32 to vector<8x1024xf32>
    %18 = arith.addf %14, %17 : vector<8x1024xf32>
    %19 = tpu.reciprocal %18 {approx = true} : vector<8x1024xf32> -> vector<8x1024xf32>
    %20 = arith.mulf %16, %19 : vector<8x1024xf32>
    %21 = arith.mulf %6, %20 : vector<8x1024xf32>
    %22 = arith.truncf %21 : vector<8x1024xf32> to vector<8x1024xbf16>
    %c0_10 = arith.constant 0 : index
    %c0_11 = arith.constant 0 : index
    %23 = vector.load %arg4[%c0_10, %c0_11] : memref<1024x512xbf16, #tpu.memory_space<vmem>>, vector<1024x512xbf16>
    %cst_12 = arith.constant dense<0.000000e+00> : vector<8x512xf32>
    %24 = tpu.matmul %22, %23, %cst_12 {dimension_numbers = #tpu.dot_dimension_numbers<[1], [0], [0], [1], [0, 0, 1, 1], [], []>} : vector<8x1024xbf16>, vector<1024x512xbf16>, vector<8x512xf32> -> vector<8x512xf32>
    %c0_13 = arith.constant 0 : index
    %c0_14 = arith.constant 0 : index
    %25 = vector.load %arg5[%c0_13, %c0_14] : memref<1x512xf32, #tpu.memory_space<vmem>>, vector<1x512xf32>
    %26 = vector.broadcast %25 : vector<1x512xf32> to vector<8x512xf32>
    %27 = arith.addf %24, %26 : vector<8x512xf32>
    %cst_15 = arith.constant 2.000000e+01 : f32
    %28 = vector.broadcast %cst_15 : f32 to vector<8x512xf32>
    %29 = arith.minimumf %27, %28 : vector<8x512xf32>
    %30 = math.exp %29 : vector<8x512xf32>
    %cst_16 = arith.constant 1.000000e+00 : f32
    %31 = vector.broadcast %cst_16 : f32 to vector<8x512xf32>
    %32 = arith.addf %31, %30 : vector<8x512xf32>
    %cst_17 = arith.constant 1.000000e+00 : f32
    %33 = vector.broadcast %cst_17 : f32 to vector<8x512xf32>
    %34 = arith.addf %33, %30 : vector<8x512xf32>
    %35 = arith.mulf %32, %34 : vector<8x512xf32>
    %cst_18 = arith.constant 1.000000e+00 : f32
    %36 = vector.broadcast %cst_18 : f32 to vector<8x512xf32>
    %37 = arith.subf %35, %36 : vector<8x512xf32>
    %cst_19 = arith.constant 1.000000e+00 : f32
    %38 = vector.broadcast %cst_19 : f32 to vector<8x512xf32>
    %39 = arith.addf %35, %38 : vector<8x512xf32>
    %40 = tpu.reciprocal %39 {approx = true} : vector<8x512xf32> -> vector<8x512xf32>
    %41 = arith.mulf %37, %40 : vector<8x512xf32>
    %42 = arith.mulf %27, %41 : vector<8x512xf32>
    %43 = arith.truncf %42 : vector<8x512xf32> to vector<8x512xbf16>
    %c0_20 = arith.constant 0 : index
    %c0_21 = arith.constant 0 : index
    %44 = vector.load %arg6[%c0_20, %c0_21] : memref<512x256xbf16, #tpu.memory_space<vmem>>, vector<512x256xbf16>
    %cst_22 = arith.constant dense<0.000000e+00> : vector<8x256xf32>
    %45 = tpu.matmul %43, %44, %cst_22 {dimension_numbers = #tpu.dot_dimension_numbers<[1], [0], [0], [1], [0, 0, 1, 1], [], []>} : vector<8x512xbf16>, vector<512x256xbf16>, vector<8x256xf32> -> vector<8x256xf32>
    %c0_23 = arith.constant 0 : index
    %c0_24 = arith.constant 0 : index
    %46 = vector.load %arg7[%c0_23, %c0_24] : memref<1x256xf32, #tpu.memory_space<vmem>>, vector<1x256xf32>
    %47 = vector.broadcast %46 : vector<1x256xf32> to vector<8x256xf32>
    %48 = arith.addf %45, %47 : vector<8x256xf32>
    %cst_25 = arith.constant 2.000000e+01 : f32
    %49 = vector.broadcast %cst_25 : f32 to vector<8x256xf32>
    %50 = arith.minimumf %48, %49 : vector<8x256xf32>
    %51 = math.exp %50 : vector<8x256xf32>
    %cst_26 = arith.constant 1.000000e+00 : f32
    %52 = vector.broadcast %cst_26 : f32 to vector<8x256xf32>
    %53 = arith.addf %52, %51 : vector<8x256xf32>
    %cst_27 = arith.constant 1.000000e+00 : f32
    %54 = vector.broadcast %cst_27 : f32 to vector<8x256xf32>
    %55 = arith.addf %54, %51 : vector<8x256xf32>
    %56 = arith.mulf %53, %55 : vector<8x256xf32>
    %cst_28 = arith.constant 1.000000e+00 : f32
    %57 = vector.broadcast %cst_28 : f32 to vector<8x256xf32>
    %58 = arith.subf %56, %57 : vector<8x256xf32>
    %cst_29 = arith.constant 1.000000e+00 : f32
    %59 = vector.broadcast %cst_29 : f32 to vector<8x256xf32>
    %60 = arith.addf %56, %59 : vector<8x256xf32>
    %61 = tpu.reciprocal %60 {approx = true} : vector<8x256xf32> -> vector<8x256xf32>
    %62 = arith.mulf %58, %61 : vector<8x256xf32>
    %63 = arith.mulf %48, %62 : vector<8x256xf32>
    %64 = arith.truncf %63 : vector<8x256xf32> to vector<8x256xbf16>
    %c0_30 = arith.constant 0 : index
    %c0_31 = arith.constant 0 : index
    %65 = vector.load %arg8[%c0_30, %c0_31] : memref<256x64xbf16, #tpu.memory_space<vmem>>, vector<256x64xbf16>
    %cst_32 = arith.constant dense<0.000000e+00> : vector<8x64xf32>
    %66 = tpu.matmul %64, %65, %cst_32 {dimension_numbers = #tpu.dot_dimension_numbers<[1], [0], [0], [1], [0, 0, 1, 1], [], []>} : vector<8x256xbf16>, vector<256x64xbf16>, vector<8x64xf32> -> vector<8x64xf32>
    %c0_33 = arith.constant 0 : index
    %c0_34 = arith.constant 0 : index
    %67 = vector.load %arg9[%c0_33, %c0_34] : memref<1x64xf32, #tpu.memory_space<vmem>>, vector<1x64xf32>
    %68 = vector.broadcast %67 : vector<1x64xf32> to vector<8x64xf32>
    %69 = arith.addf %66, %68 : vector<8x64xf32>
    %cst_35 = arith.constant 2.000000e+01 : f32
    %70 = vector.broadcast %cst_35 : f32 to vector<8x64xf32>
    %71 = arith.minimumf %69, %70 : vector<8x64xf32>
    %72 = math.exp %71 : vector<8x64xf32>
    %cst_36 = arith.constant 1.000000e+00 : f32
    %73 = vector.broadcast %cst_36 : f32 to vector<8x64xf32>
    %74 = arith.addf %73, %72 : vector<8x64xf32>
    %cst_37 = arith.constant 1.000000e+00 : f32
    %75 = vector.broadcast %cst_37 : f32 to vector<8x64xf32>
    %76 = arith.addf %75, %72 : vector<8x64xf32>
    %77 = arith.mulf %74, %76 : vector<8x64xf32>
    %cst_38 = arith.constant 1.000000e+00 : f32
    %78 = vector.broadcast %cst_38 : f32 to vector<8x64xf32>
    %79 = arith.subf %77, %78 : vector<8x64xf32>
    %cst_39 = arith.constant 1.000000e+00 : f32
    %80 = vector.broadcast %cst_39 : f32 to vector<8x64xf32>
    %81 = arith.addf %77, %80 : vector<8x64xf32>
    %82 = tpu.reciprocal %81 {approx = true} : vector<8x64xf32> -> vector<8x64xf32>
    %83 = arith.mulf %79, %82 : vector<8x64xf32>
    %84 = arith.mulf %69, %83 : vector<8x64xf32>
    %85 = arith.truncf %84 : vector<8x64xf32> to vector<8x64xbf16>
    %c0_40 = arith.constant 0 : index
    %c0_41 = arith.constant 0 : index
    %86 = vector.load %arg10[%c0_40, %c0_41] : memref<64x128xbf16, #tpu.memory_space<vmem>>, vector<64x128xbf16>
    %cst_42 = arith.constant dense<0.000000e+00> : vector<8x128xf32>
    %87 = tpu.matmul %85, %86, %cst_42 {dimension_numbers = #tpu.dot_dimension_numbers<[1], [0], [0], [1], [0, 0, 1, 1], [], []>} : vector<8x64xbf16>, vector<64x128xbf16>, vector<8x128xf32> -> vector<8x128xf32>
    %c0_43 = arith.constant 0 : index
    %c0_44 = arith.constant 0 : index
    %88 = vector.load %arg11[%c0_43, %c0_44] : memref<1x128xf32, #tpu.memory_space<vmem>>, vector<1x128xf32>
    %89 = vector.broadcast %88 : vector<1x128xf32> to vector<8x128xf32>
    %90 = arith.addf %87, %89 : vector<8x128xf32>
    %c0_45 = arith.constant 0 : index
    %c0_46 = arith.constant 0 : index
    %91 = vector.load %arg12[%c0_45, %c0_46] : memref<8x128xf32, #tpu.memory_space<vmem>>, vector<8x128xf32>
    tpu.vector_store %arg12[%c0_45, %c0_46], %90 {strides = array<i32>} : memref<8x128xf32, #tpu.memory_space<vmem>>, vector<8x128xf32>,
    return
  }
  func.func @transform_0(%arg0: i32) -> (i32, i32) {
    %c0_i32 = arith.constant 0 : i32
    %c0_i32_0 = arith.constant 0 : i32
    return %arg0, %c0_i32 : i32, i32
  }
  func.func @transform_1(%arg0: i32) -> (i32, i32) {
    %c0_i32 = arith.constant 0 : i32
    %c0_i32_0 = arith.constant 0 : i32
    %c0_i32_1 = arith.constant 0 : i32
    return %c0_i32, %c0_i32_0 : i32, i32
  }
  func.func @transform_2(%arg0: i32) -> (i32, i32) {
    %c0_i32 = arith.constant 0 : i32
    %c0_i32_0 = arith.constant 0 : i32
    %c0_i32_1 = arith.constant 0 : i32
    return %c0_i32, %c0_i32_0 : i32, i32
  }
  func.func @transform_3(%arg0: i32) -> (i32, i32) {
    %c0_i32 = arith.constant 0 : i32
    %c0_i32_0 = arith.constant 0 : i32
    %c0_i32_1 = arith.constant 0 : i32
    return %c0_i32, %c0_i32_0 : i32, i32
  }
  func.func @transform_4(%arg0: i32) -> (i32, i32) {
    %c0_i32 = arith.constant 0 : i32
    %c0_i32_0 = arith.constant 0 : i32
    %c0_i32_1 = arith.constant 0 : i32
    return %c0_i32, %c0_i32_0 : i32, i32
  }
  func.func @transform_5(%arg0: i32) -> (i32, i32) {
    %c0_i32 = arith.constant 0 : i32
    %c0_i32_0 = arith.constant 0 : i32
    %c0_i32_1 = arith.constant 0 : i32
    return %c0_i32, %c0_i32_0 : i32, i32
  }
  func.func @transform_6(%arg0: i32) -> (i32, i32) {
    %c0_i32 = arith.constant 0 : i32
    %c0_i32_0 = arith.constant 0 : i32
    %c0_i32_1 = arith.constant 0 : i32
    return %c0_i32, %c0_i32_0 : i32, i32
  }
  func.func @transform_7(%arg0: i32) -> (i32, i32) {
    %c0_i32 = arith.constant 0 : i32
    %c0_i32_0 = arith.constant 0 : i32
    %c0_i32_1 = arith.constant 0 : i32
    return %c0_i32, %c0_i32_0 : i32, i32
  }
  func.func @transform_8(%arg0: i32) -> (i32, i32) {
    %c0_i32 = arith.constant 0 : i32
    %c0_i32_0 = arith.constant 0 : i32
    %c0_i32_1 = arith.constant 0 : i32
    return %c0_i32, %c0_i32_0 : i32, i32
  }
  func.func @transform_9(%arg0: i32) -> (i32, i32) {
    %c0_i32 = arith.constant 0 : i32
    %c0_i32_0 = arith.constant 0 : i32
    %c0_i32_1 = arith.constant 0 : i32
    return %c0_i32, %c0_i32_0 : i32, i32
  }
  func.func @transform_10(%arg0: i32) -> (i32, i32) {
    %c0_i32 = arith.constant 0 : i32
    %c0_i32_0 = arith.constant 0 : i32
    %c0_i32_1 = arith.constant 0 : i32
    return %c0_i32, %c0_i32_0 : i32, i32
  }
  func.func @transform_11(%arg0: i32) -> (i32, i32) {
    %c0_i32 = arith.constant 0 : i32
    %c0_i32_0 = arith.constant 0 : i32
    return %arg0, %c0_i32 : i32, i32
  }
}

</mosaic_0001>

<bundles_post_ra>
// kernel: tpu_custom_call.1
= control target key start
LH: loop header
LB: loop body
LE: loop exit
PB: predicated region body
PF: predicated region fallthrough
CT: control target
= control target key end

     0   :  { %16 = vsyncpa [#allocation3], 0  ;;  %s5519_s0 = inlined_call_operand.vmem [shape: f32[8,32], index: 0, kind: input, shape index: {}]   ;;  %s5520_s1 = inlined_call_operand.vmem [shape: bf16[32,1024], index: 1, kind: input, shape index: {}]   ;;  %s5521_s2 = inlined_call_operand.vmem [shape: f32[1,1024], index: 2, kind: input, shape index: {}]   ;;  %s5522_s3 = inlined_call_operand.hbm [shape: bf16[1024,512], index: 3, kind: input, shape index: {}]   ;;  %s5523_s4 = inlined_call_operand.vmem [shape: f32[1,512], index: 4, kind: input, shape index: {}]   ;;  %s5524_s5 = inlined_call_operand.hbm [shape: bf16[512,256], index: 5, kind: input, shape index: {}]   ;;  %s5525_s6 = inlined_call_operand.vmem [shape: f32[1,256], index: 6, kind: input, shape index: {}]   ;;  %s5526_s7 = inlined_call_operand.vmem [shape: bf16[256,64], index: 7, kind: input, shape index: {}]   ;;  %s5527_s8 = inlined_call_operand.vmem [shape: f32[1,64], index: 8, kind: input, shape index: {}]   ;;  %s5528_s9 = inlined_call_operand.vmem [shape: bf16[64,128], index: 9, kind: input, shape index: {}]   ;;  %s5529_s10 = inlined_call_operand.vmem [shape: f32[1,128], index: 10, kind: input, shape index: {}]   ;;  %s5530_s11 = inlined_call_operand.hbm [shape: f32[8,128], index: 11, kind: output, shape index: {}]  }
   0x1   :  { %17 = vsyncpa [#allocation6], 0 }
   0x2   :  { %18 = vsyncpa [#allocation4], 0  ;;  %s29_s19 = sshll.u32 %s5522_s3, 4  ;;  %s5099_s20 = smov [#allocation2]   ;;  %s30_s19 = int_to_ptr.hbm [resolvable:$true] %s29_s19 }
   0x3   :  { %s31_s21 = sshll.u32 %s5099_s20, 4  ;;  %s44_s24 = sshll.u32 %s5524_s5, 4  ;;  %s32_s21 = int_to_ptr.vmem [resolvable:$true] %s31_s21  ;;  %s45_s24 = int_to_ptr.hbm [resolvable:$true] %s44_s24 }
   0x4   :  { %s5100_s25 = smov 256   ;;  %s5101_s26 = smov 16  }
   0x5   :  { %37 = dma.hbm_to_vmem [thread:$0]  %s30_s19, 32768, %s32_s21, [#allocation3], %s5100_s25, %s5100_s25, %s5101_s26  }
   0x6   :  { %s5102_s27 = smov [#allocation5]   ;;  %s5103_s29 = smov 128  }
   0x7   :  { %s46_s28 = sshll.u32 %s5102_s27, 4  ;;  %s5104_s30 = smov 8   ;;  %s47_s28 = int_to_ptr.vmem [resolvable:$true] %s46_s28 }
   0x8   :  { %52 = dma.hbm_to_vmem [thread:$0]  %s45_s24, 8192, %s47_s28, [#allocation6], %s5103_s29, %s5103_s29, %s5104_s30  }
   0x9   :  { %5093 = dma.done.wait [#allocation3], 32768  }
   0xa   :  { %5094 = vsyncadd [#allocation3], 4294934528 }
   0xb   :  { %5095 = dma.done.wait [#allocation6], 8192  }
   0xc   :  { %5096 = vsyncadd [#allocation6], 4294959104  ;;  %v3181_v0 = vld [vmem:[%s5520_s1 + $0x40] sm:$0xf]  ;;  %v4603_v2 = vld [vmem:[%s5520_s1 + $0x44] sm:$0xf] }
   0xd   :  { %v4607_v1 = vld [vmem:[%s5520_s1 + $0x5c] sm:$0xf0]  ;;  %v3183_v4 = vld [vmem:[%s5520_s1 + $0x60] sm:$0xf0]  ;;  %v3189_v5 = vld [vmem:[%s5520_s1 + $0x48] sm:$0xf] }
   0xe   :  { %v3182_v3 = vor.u32 %v4607_v1, %v3181_v0  ;;  %v4608_v6 = vld [vmem:[%s5520_s1 + $0x64] sm:$0xf0]  ;;  %v3186_v7 = vor.u32 %v4603_v2, %v3183_v4  ;;  %v3149_v9 = vld [vmem:[%s5520_s1] sm:$0xf]  ;;  %v4595_v11 = vld [vmem:[%s5520_s1 + $0x4] sm:$0xf] }
   0xf   :  { %v3190_v8 = vor.u32 %v4608_v6, %v3189_v5  ;;  %v4599_v10 = vld [vmem:[%s5520_s1 + $0x1c] sm:$0xf0]  ;;  %v3151_v13 = vld [vmem:[%s5520_s1 + $0x20] sm:$0xf0]  ;;  %v3157_v14 = vld [vmem:[%s5520_s1 + $0x8] sm:$0xf] }
  0x10   :  { %198 = vmatpush.bf16.msra.mxu3 %v3182_v3  ;;  %v3150_v12 = vor.u32 %v4599_v10, %v3149_v9  ;;  %v4600_v15 = vld [vmem:[%s5520_s1 + $0x24] sm:$0xf0]  ;;  %211 = vmatpush.bf16.msra.mxu1 %v3186_v7  ;;  %v3154_v16 = vor.u32 %v4595_v11, %v3151_v13  ;;  %v72_v18 = vld [vmem:[%s5519_s0] sm:$0xff]  ;;  %vm188_vm0 = vcmask 261120   ;;  %v4604_v19 = vld [vmem:[%s5520_s1 + $0x4c] sm:$0xf] }
  0x11   :  { %224 = vmatpush.bf16.msra.mxu2 %v3190_v8  ;;  %v3158_v17 = vor.u32 %v4600_v15, %v3157_v14  ;;  %v3191_v20 = vld [vmem:[%s5520_s1 + $0x68] sm:$0xf0]  ;;  %v4605_v22 = vld [vmem:[%s5520_s1 + $0x54] sm:$0xf]  ;;  %v3205_v24 = vld [vmem:[%s5520_s1 + $0x58] sm:$0xf]  ;;  %v5226_v25 = vpack.c.bf16 %v72_v18, %v72_v18 }
  0x12   :  { %v3194_v21 = vor.u32 %v4604_v19, %v3191_v20  ;;  %v3199_v23 = vld [vmem:[%s5520_s1 + $0x70] sm:$0xf0]  ;;  %v4610_v27 = vld [vmem:[%s5520_s1 + $0x74] sm:$0xf0]  ;;  %v4596_v28 = vld [vmem:[%s5520_s1 + $0xc] sm:$0xf] }
  0x13   :  { %v3202_v26 = vor.u32 %v4605_v22, %v3199_v23  ;;  %v3159_v29 = vld [vmem:[%s5520_s1 + $0x28] sm:$0xf0]  ;;  %v3206_v30 = vor.u32 %v4610_v27, %v3205_v24  ;;  %v4597_v31 = vld [vmem:[%s5520_s1 + $0x14] sm:$0xf]  ;;  %v3173_v33 = vld [vmem:[%s5520_s1 + $0x18] sm:$0xf] }
  0x14   :  { %199 = vmatpush.bf16.msra.mxu3 %v3150_v12  ;;  %v3167_v32 = vld [vmem:[%s5520_s1 + $0x30] sm:$0xf0]  ;;  %212 = vmatpush.bf16.msra.mxu1 %v3154_v16  ;;  %v4602_v34 = vld [vmem:[%s5520_s1 + $0x34] sm:$0xf0]  ;;  %v3197_v35 = vld [vmem:[%s5520_s1 + $0x50] sm:$0xf]  ;;  %v3162_v37 = vor.u32 %v4596_v28, %v3159_v29 }
  0x15   :  { %225 = vmatpush.bf16.msra.mxu2 %v3158_v17  ;;  %v4609_v36 = vld [vmem:[%s5520_s1 + $0x6c] sm:$0xf0]  ;;  %v3170_v38 = vor.u32 %v4597_v31, %v3167_v32  ;;  %v4606_v42 = vld [vmem:[%s5520_s1 + $0x5c] sm:$0xf]  ;;  %v3174_v43 = vor.u32 %v4602_v34, %v3173_v33  ;;  %v3469_v48 = vld [vmem:[#allocation2 + $0x1e0] sm:$0xf] }
  0x16   :  { %v3198_v39 = vor.u32 %v4609_v36, %v3197_v35  ;;  %v3165_v40 = vld [vmem:[%s5520_s1 + $0x10] sm:$0xf]  ;;  %v3207_v44 = vld [vmem:[%s5520_s1 + $0x78] sm:$0xf0]  ;;  %v3453_v50 = vld [vmem:[#allocation2 + $0x1c0] sm:$0xf] }
  0x17   :  { %v4601_v41 = vld [vmem:[%s5520_s1 + $0x2c] sm:$0xf0]  ;;  %3211 = vmatmul.msk.bf16.vlgmr.msra.gmra.mxu3 %vm188_vm0, %v5226_v25  ;;  %v4598_v45 = vld [vmem:[%s5520_s1 + $0x1c] sm:$0xf]  ;;  %3212 = vmatmul.msk.bf16.vlgmr.msra.gmra.mxu1 %vm188_vm0, %v5226_v25  ;;  %v3210_v47 = vor.u32 %v4606_v42, %v3207_v44  ;;  %v3341_v54 = vld [vmem:[#allocation2 + $0xe0] sm:$0xf] }
  0x18   :  { %237 = vmatpush.bf16.msrb.mxu3 %v3194_v21  ;;  %263 = vmatpush.bf16.msrb.mxu1 %v3202_v26  ;;  %v3175_v46 = vld [vmem:[%s5520_s1 + $0x38] sm:$0xf0]  ;;  %v4673_v49 = vld [vmem:[#allocation2 + $0x1ec] sm:$0xf0]  ;;  %v3166_v51 = vor.u32 %v4601_v41, %v3165_v40  ;;  %v3597_v57 = vld [vmem:[#allocation2 + $0x2e0] sm:$0xf] }
  0x19   :  { %276 = vmatpush.bf16.msrb.mxu2 %v3206_v30  ;;  %250 = vmatpush.bf16.msra.mxu0 %v3198_v39  ;;  %v3470_v52 = vor.u32 %v4673_v49, %v3469_v48  ;;  %v4669_v53 = vld [vmem:[#allocation2 + $0x1cc] sm:$0xf0]  ;;  %v3178_v59 = vor.u32 %v4598_v45, %v3175_v46  ;;  %v3325_v61 = vld [vmem:[#allocation2 + $0xc0] sm:$0xf]  ;;  %vm3111_vm1 = vcmask 523264   ;;  %s5105_s29 = smov [#allocation7]  }
  0x1a   :  { %3213 = vmatmul.msk.bf16.vlgmr.msra.gmra.mxu2 %vm188_vm0, %v5226_v25  ;;  %v4641_v55 = vld [vmem:[#allocation2 + $0xec] sm:$0xf0]  ;;  %v3454_v63 = vor.u32 %v4669_v53, %v3453_v50  ;;  %v3581_v0 = vld [vmem:[#allocation2 + $0x2c0] sm:$0xf]  ;;  %s3134_s30 = sshll.u32 %s5105_s29, 4  ;;  %s3136_s12 = sshll.u32 %s5530_s11, 4  ;;  %s3135_s30 = int_to_ptr.vmem [resolvable:$true] %s3134_s30  ;;  %s3137_s12 = int_to_ptr.hbm [resolvable:$true] %s3136_s12 }
  0x1b   :  { %v3342_v56 = vor.u32 %v4641_v55, %v3341_v54  ;;  %v4705_v58 = vld [vmem:[#allocation2 + $0x2ec] sm:$0xf0]  ;;  %v3437_v2 = vld [vmem:[#allocation2 + $0x1a0] sm:$0xf] }
  0x1c   :  { %238 = vmatpush.bf16.msrb.mxu3 %v3162_v37  ;;  %264 = vmatpush.bf16.msrb.mxu1 %v3170_v38  ;;  %v3598_v60 = vor.u32 %v4705_v58, %v3597_v57  ;;  %v4637_v62 = vld [vmem:[#allocation2 + $0xcc] sm:$0xf0]  ;;  %v3565_v6 = vld [vmem:[#allocation2 + $0x2a0] sm:$0xf] }
  0x1d   :  { %277 = vmatpush.bf16.msrb.mxu2 %v3174_v43  ;;  %v4701_v1 = vld [vmem:[#allocation2 + $0x2cc] sm:$0xf0]  ;;  %251 = vmatpush.bf16.msra.mxu0 %v3166_v51  ;;  %v3326_v5 = vor.u32 %v4637_v62, %v3325_v61  ;;  %v3309_v8 = vld [vmem:[#allocation2 + $0xa0] sm:$0xf] }
  0x1e   :  { %v4665_v3 = vld [vmem:[#allocation2 + $0x1ac] sm:$0xf0]  ;;  %v3582_v4 = vor.u32 %v4701_v1, %v3581_v0  ;;  %v3421_v11 = vld [vmem:[#allocation2 + $0x180] sm:$0xf] }
  0x1f   :  { %v4697_v7 = vld [vmem:[#allocation2 + $0x2ac] sm:$0xf0]  ;;  %v3438_v10 = vor.u32 %v4665_v3, %v3437_v2  ;;  %v3293_v15 = vld [vmem:[#allocation2 + $0x80] sm:$0xf] }
  0x20   :  { %289 = vmatpush.bf16.msra.mxu3 %v3210_v47  ;;  %1943 = vmatpush.bf16.msra.mxu1 %v3470_v52  ;;  %v4633_v9 = vld [vmem:[#allocation2 + $0xac] sm:$0xf0]  ;;  %v3566_v13 = vor.u32 %v4697_v7, %v3565_v6  ;;  %v3549_v16 = vld [vmem:[#allocation2 + $0x280] sm:$0xf] }
  0x21   :  { %1956 = vmatpush.bf16.msra.mxu2 %v3598_v60  ;;  %1930 = vmatpush.bf16.msrb.mxu0 %v3342_v56  ;;  %v4661_v12 = vld [vmem:[#allocation2 + $0x18c] sm:$0xf0]  ;;  %v3310_v14 = vor.u32 %v4633_v9, %v3309_v8  ;;  %v3725_v19 = vld [vmem:[#allocation2 + $0x3e0] sm:$0xf] }
  0x22   :  { %3215 = vmatmul.msk.bf16.vlgmr.msra.gmra.mxu0 %vm188_vm0, %v5226_v25  ;;  %v4693_v17 = vld [vmem:[#allocation2 + $0x28c] sm:$0xf0]  ;;  %v3422_v21 = vor.u32 %v4661_v12, %v3421_v11  ;;  %v3405_v22 = vld [vmem:[#allocation2 + $0x160] sm:$0xf] }
  0x23   :  { %v4629_v18 = vld [vmem:[#allocation2 + $0x8c] sm:$0xf0]  ;;  %v3550_v23 = vor.u32 %v4693_v17, %v3549_v16  ;;  %v3533_v27 = vld [vmem:[#allocation2 + $0x260] sm:$0xf] }
  0x24   :  { %290 = vmatpush.bf16.msra.mxu3 %v3178_v59  ;;  %1944 = vmatpush.bf16.msra.mxu1 %v3454_v63  ;;  %v4737_v20 = vld [vmem:[#allocation2 + $0x3ec] sm:$0xf0]  ;;  %v3294_v26 = vor.u32 %v4629_v18, %v3293_v15  ;;  %v3277_v30 = vld [vmem:[#allocation2 + $0x60] sm:$0xf] }
  0x25   :  { %1957 = vmatpush.bf16.msra.mxu2 %v3582_v4  ;;  %1931 = vmatpush.bf16.msrb.mxu0 %v3326_v5  ;;  %v4657_v24 = vld [vmem:[#allocation2 + $0x16c] sm:$0xf0]  ;;  %v3726_v29 = vor.u32 %v4737_v20, %v3725_v19  ;;  %v3389_v34 = vld [vmem:[#allocation2 + $0x140] sm:$0xf] }
  0x26   :  { %v4689_v28 = vld [vmem:[#allocation2 + $0x26c] sm:$0xf0]  ;;  %v3406_v32 = vor.u32 %v4657_v24, %v3405_v22  ;;  %v3373_v38 = vld [vmem:[#allocation2 + $0x120] sm:$0xf] }
  0x27   :  { %3214 = vmatmul.msk.bf16.vlgmr.msrb.gmra.mxu3 %vm188_vm0, %v5226_v25  ;;  %v4625_v31 = vld [vmem:[#allocation2 + $0x6c] sm:$0xf0]  ;;  %3216 = vmatmul.msk.bf16.vlgmr.msrb.gmra.mxu1 %vm188_vm0, %v5226_v25  ;;  %v3534_v33 = vor.u32 %v4689_v28, %v3533_v27  ;;  %v3261_v41 = vld [vmem:[#allocation2 + $0x40] sm:$0xf] }
  0x28   :  { %1945 = vmatpush.bf16.msra.mxu1 %v3438_v10  ;;  %v4653_v35 = vld [vmem:[#allocation2 + $0x14c] sm:$0xf0]  ;;  %v3278_v36 = vor.u32 %v4625_v31, %v3277_v30  ;;  %1969 = vmatpush.bf16.msrb.mxu3 %v3726_v29  ;;  %v3517_v43 = vld [vmem:[#allocation2 + $0x240] sm:$0xf] }
  0x29   :  { %1958 = vmatpush.bf16.msra.mxu2 %v3566_v13  ;;  %1932 = vmatpush.bf16.msrb.mxu0 %v3310_v14  ;;  %v3390_v37 = vor.u32 %v4653_v35, %v3389_v34  ;;  %v4649_v39 = vld [vmem:[#allocation2 + $0x12c] sm:$0xf0]  ;;  %v3709_v46 = vld [vmem:[#allocation2 + $0x3c0] sm:$0xf] }
  0x2a   :  { %3217 = vmatmul.msk.bf16.vlgmr.msrb.gmra.mxu2 %vm188_vm0, %v5226_v25  ;;  %v3374_v40 = vor.u32 %v4649_v39, %v3373_v38  ;;  %v4621_v42 = vld [vmem:[#allocation2 + $0x4c] sm:$0xf0]  ;;  %v3357_v50 = vld [vmem:[#allocation2 + $0x100] sm:$0xf] }
  0x2b   :  { %v3262_v44 = vor.u32 %v4621_v42, %v3261_v41  ;;  %v4685_v45 = vld [vmem:[#allocation2 + $0x24c] sm:$0xf0]  ;;  %v3981_v53 = vld [vmem:[#allocation2 + $0x5e0] sm:$0xf] }
  0x2c   :  { %1946 = vmatpush.bf16.msra.mxu1 %v3422_v21  ;;  %v4733_v47 = vld [vmem:[#allocation2 + $0x3cc] sm:$0xf0]  ;;  %v3518_v48 = vor.u32 %v4685_v45, %v3517_v43  ;;  %v3245_v56 = vld [vmem:[#allocation2 + $0x20] sm:$0xf] }
  0x2d   :  { %1959 = vmatpush.bf16.msra.mxu2 %v3550_v23  ;;  %1933 = vmatpush.bf16.msrb.mxu0 %v3294_v26  ;;  %v3710_v49 = vor.u32 %v4733_v47, %v3709_v46  ;;  %v4645_v51 = vld [vmem:[#allocation2 + $0x10c] sm:$0xf0]  ;;  %v3501_v57 = vld [vmem:[#allocation2 + $0x220] sm:$0xf] }
  0x2e   :  { %v3358_v52 = vor.u32 %v4645_v51, %v3357_v50  ;;  %v4801_v54 = vld [vmem:[#allocation2 + $0x5ec] sm:$0xf0]  ;;  %v3693_v60 = vld [vmem:[#allocation2 + $0x3a0] sm:$0xf] }
  0x2f   :  { %1970 = vmatpush.bf16.msrb.mxu3 %v3710_v49  ;;  %v3982_v55 = vor.u32 %v4801_v54, %v3981_v53  ;;  %v4681_v59 = vld [vmem:[#allocation2 + $0x22c] sm:$0xf0]  ;;  %v3965_v0 = vld [vmem:[#allocation2 + $0x5c0] sm:$0xf] }
  0x30   :  { %1947 = vmatpush.bf16.msra.mxu1 %v3406_v32  ;;  %v4729_v61 = vld [vmem:[#allocation2 + $0x3ac] sm:$0xf0]  ;;  %v3502_v62 = vor.u32 %v4681_v59, %v3501_v57  ;;  %v3229_v3 = vld [vmem:[#allocation2] sm:$0xf] }
  0x31   :  { %1960 = vmatpush.bf16.msra.mxu2 %v3534_v33  ;;  %1934 = vmatpush.bf16.msrb.mxu0 %v3278_v36  ;;  %v3694_v63 = vor.u32 %v4729_v61, %v3693_v60  ;;  %v4797_v1 = vld [vmem:[#allocation2 + $0x5cc] sm:$0xf0]  ;;  %v3485_v5 = vld [vmem:[#allocation2 + $0x200] sm:$0xf] }
  0x32   :  { %v3966_v2 = vor.u32 %v4797_v1, %v3965_v0  ;;  %v4613_v4 = vld [vmem:[#allocation2 + $0xc] sm:$0xf0]  ;;  %v3677_v8 = vld [vmem:[#allocation2 + $0x380] sm:$0xf] }
  0x33   :  { %1971 = vmatpush.bf16.msrb.mxu3 %v3694_v63  ;;  %v3230_v6 = vor.u32 %v4613_v4, %v3229_v3  ;;  %v4677_v7 = vld [vmem:[#allocation2 + $0x20c] sm:$0xf0]  ;;  %v3853_v12 = vld [vmem:[#allocation2 + $0x4e0] sm:$0xf] }
  0x34   :  { %1948 = vmatpush.bf16.msra.mxu1 %v3390_v37  ;;  %v4725_v9 = vld [vmem:[#allocation2 + $0x38c] sm:$0xf0]  ;;  %v3486_v10 = vor.u32 %v4677_v7, %v3485_v5  ;;  %v4109_v14 = vld [vmem:[#allocation2 + $0x6e0] sm:$0xf] }
  0x35   :  { %1935 = vmatpush.bf16.msrb.mxu0 %v3262_v44  ;;  %1961 = vmatpush.bf16.msra.mxu2 %v3518_v48  ;;  %v3678_v11 = vor.u32 %v4725_v9, %v3677_v8  ;;  %v4769_v13 = vld [vmem:[#allocation2 + $0x4ec] sm:$0xf0]  ;;  %v3949_v17 = vld [vmem:[#allocation2 + $0x5a0] sm:$0xf] }
  0x36   :  { %v3854_v15 = vor.u32 %v4769_v13, %v3853_v12  ;;  %v4833_v16 = vld [vmem:[#allocation2 + $0x6ec] sm:$0xf0]  ;;  %v3661_v21 = vld [vmem:[#allocation2 + $0x360] sm:$0xf] }
  0x37   :  { %3218 = vmatmul.msk.bf16.vlgmr.msra.gmra.mxu3 %vm188_vm0, %v5226_v25  ;;  %v4617_v25 = vld [vmem:[#allocation2 + $0x2c] sm:$0xf0]  ;;  %v4110_v19 = vor.u32 %v4833_v16, %v4109_v14  ;;  %v3837_v24 = vld [vmem:[#allocation2 + $0x4c0] sm:$0xf] }
  0x38   :  { %1949 = vmatpush.bf16.msra.mxu1 %v3374_v40  ;;  %v3246_v58 = vor.u32 %v4617_v25, %v3245_v56  ;;  %v4793_v18 = vld [vmem:[#allocation2 + $0x5ac] sm:$0xf0]  ;;  %1972 = vmatpush.bf16.msrb.mxu3 %v3678_v11  ;;  %v4093_v27 = vld [vmem:[#allocation2 + $0x6c0] sm:$0xf] }
  0x39   :  { %1962 = vmatpush.bf16.msra.mxu2 %v3502_v62  ;;  %v3950_v20 = vor.u32 %v4793_v18, %v3949_v17  ;;  %v4721_v22 = vld [vmem:[#allocation2 + $0x36c] sm:$0xf0]  ;;  %v3933_v31 = vld [vmem:[#allocation2 + $0x580] sm:$0xf] }
  0x3a   :  { %1936 = vmatpush.bf16.msrb.mxu0 %v3246_v58  ;;  %v3662_v23 = vor.u32 %v4721_v22, %v3661_v21  ;;  %v4765_v26 = vld [vmem:[#allocation2 + $0x4cc] sm:$0xf0]  ;;  %v3645_v34 = vld [vmem:[#allocation2 + $0x340] sm:$0xf] }
  0x3b   :  { %v3838_v28 = vor.u32 %v4765_v26, %v3837_v24  ;;  %v4829_v29 = vld [vmem:[#allocation2 + $0x6cc] sm:$0xf0]  ;;  %v3821_v37 = vld [vmem:[#allocation2 + $0x4a0] sm:$0xf] }
  0x3c   :  { %1950 = vmatpush.bf16.msra.mxu1 %v3358_v52  ;;  %v4094_v30 = vor.u32 %v4829_v29, %v4093_v27  ;;  %v4789_v32 = vld [vmem:[#allocation2 + $0x58c] sm:$0xf0]  ;;  %1973 = vmatpush.bf16.msrb.mxu3 %v3662_v23  ;;  %v4077_v40 = vld [vmem:[#allocation2 + $0x6a0] sm:$0xf] }
  0x3d   :  { %1963 = vmatpush.bf16.msra.mxu2 %v3486_v10  ;;  %v3934_v33 = vor.u32 %v4789_v32, %v3933_v31  ;;  %v4717_v35 = vld [vmem:[#allocation2 + $0x34c] sm:$0xf0]  ;;  %v3917_v43 = vld [vmem:[#allocation2 + $0x560] sm:$0xf] }
  0x3e   :  { %1937 = vmatpush.bf16.msrb.mxu0 %v3230_v6  ;;  %v3646_v36 = vor.u32 %v4717_v35, %v3645_v34  ;;  %v4761_v38 = vld [vmem:[#allocation2 + $0x4ac] sm:$0xf0]  ;;  %v3629_v46 = vld [vmem:[#allocation2 + $0x320] sm:$0xf] }
  0x3f   :  { %v3822_v39 = vor.u32 %v4761_v38, %v3821_v37  ;;  %v4825_v41 = vld [vmem:[#allocation2 + $0x6ac] sm:$0xf0]  ;;  %v3805_v49 = vld [vmem:[#allocation2 + $0x480] sm:$0xf] }
  0x40   :  { %1995 = vmatpush.bf16.msrb.mxu1 %v3982_v55  ;;  %v4078_v42 = vor.u32 %v4825_v41, %v4077_v40  ;;  %v4785_v44 = vld [vmem:[#allocation2 + $0x56c] sm:$0xf0]  ;;  %1974 = vmatpush.bf16.msrb.mxu3 %v3646_v36  ;;  %v4061_v51 = vld [vmem:[#allocation2 + $0x680] sm:$0xf] }
  0x41   :  { %2008 = vmatpush.bf16.msrb.mxu2 %v4110_v19  ;;  %v3918_v45 = vor.u32 %v4785_v44, %v3917_v43  ;;  %v4713_v47 = vld [vmem:[#allocation2 + $0x32c] sm:$0xf0]  ;;  %v3901_v55 = vld [vmem:[#allocation2 + $0x540] sm:$0xf] }
  0x42   :  { %1982 = vmatpush.bf16.msra.mxu0 %v3854_v15  ;;  %v3630_v48 = vor.u32 %v4713_v47, %v3629_v46  ;;  %v4757_v50 = vld [vmem:[#allocation2 + $0x48c] sm:$0xf0]  ;;  %v5292_v25 = vld [vmem:[%s5521_s2] sm:$0xff] }
  0x43   :  { %v3806_v52 = vor.u32 %v4757_v50, %v3805_v49  ;;  %v4821_v53 = vld [vmem:[#allocation2 + $0x68c] sm:$0xf0]  ;;  %v3613_v58 = vld [vmem:[#allocation2 + $0x300] sm:$0xf]  ;;  %v93_v8 = vperm.slane %v5292_v25, 1  ;;  %v92_v32 = vperm.slane %v5292_v25, 0 }
  0x44   :  { %1996 = vmatpush.bf16.msrb.mxu1 %v3966_v2  ;;  %1975 = vmatpush.bf16.msrb.mxu3 %v3630_v48  ;;  %v4062_v54 = vor.u32 %v4821_v53, %v4061_v51  ;;  %v4781_v56 = vld [vmem:[#allocation2 + $0x54c] sm:$0xf0]  ;;  %v3789_v61 = vld [vmem:[#allocation2 + $0x460] sm:$0xf]  ;;  %v94_v36 = vperm.slane %v5292_v25, 2  ;;  %v96_v37 = vperm.slane %v5292_v25, 4 }
  0x45   :  { %2009 = vmatpush.bf16.msrb.mxu2 %v4094_v30  ;;  %v3902_v57 = vor.u32 %v4781_v56, %v3901_v55  ;;  %v4709_v59 = vld [vmem:[#allocation2 + $0x30c] sm:$0xf0]  ;;  %v4045_v63 = vld [vmem:[#allocation2 + $0x660] sm:$0xf] }
  0x46   :  { %1983 = vmatpush.bf16.msra.mxu0 %v3838_v28  ;;  %v3614_v60 = vor.u32 %v4709_v59, %v3613_v58  ;;  %v4753_v62 = vld [vmem:[#allocation2 + $0x46c] sm:$0xf0]  ;;  %v4237_v2 = vld [vmem:[#allocation2 + $0x7e0] sm:$0xf] }
  0x47   :  { %v3790_v0 = vor.u32 %v4753_v62, %v3789_v61  ;;  %v4817_v1 = vld [vmem:[#allocation2 + $0x66c] sm:$0xf0]  ;;  %v3885_v6 = vld [vmem:[#allocation2 + $0x520] sm:$0xf] }
  0x48   :  { %1997 = vmatpush.bf16.msrb.mxu1 %v3950_v20  ;;  %v4865_v3 = vld [vmem:[#allocation2 + $0x7ec] sm:$0xf0]  ;;  %1976 = vmatpush.bf16.msrb.mxu3 %v3614_v60  ;;  %v4046_v4 = vor.u32 %v4817_v1, %v4045_v63  ;;  %v3773_v10 = vld [vmem:[#allocation2 + $0x440] sm:$0xf]  ;;  %v97_v63 = vperm.slane %v5292_v25, 5 }
  0x49   :  { %2010 = vmatpush.bf16.msrb.mxu2 %v4078_v42  ;;  %v4238_v5 = vor.u32 %v4865_v3, %v4237_v2  ;;  %v4777_v7 = vld [vmem:[#allocation2 + $0x52c] sm:$0xf0]  ;;  %v4029_v12 = vld [vmem:[#allocation2 + $0x640] sm:$0xf] }
  0x4a   :  { %1984 = vmatpush.bf16.msra.mxu0 %v3822_v39  ;;  %v3886_v9 = vor.u32 %v4777_v7, %v3885_v6  ;;  %v4749_v11 = vld [vmem:[#allocation2 + $0x44c] sm:$0xf0]  ;;  %v4221_v15 = vld [vmem:[#allocation2 + $0x7c0] sm:$0xf] }
  0x4b   :  { %v3774_v13 = vor.u32 %v4749_v11, %v3773_v10  ;;  %v4813_v14 = vld [vmem:[#allocation2 + $0x64c] sm:$0xf0]  ;;  %v3869_v19 = vld [vmem:[#allocation2 + $0x500] sm:$0xf] }
  0x4c   :  { %1998 = vmatpush.bf16.msrb.mxu1 %v3934_v33  ;;  %2021 = vmatpush.bf16.msra.mxu3 %v4238_v5  ;;  %v4861_v16 = vld [vmem:[#allocation2 + $0x7cc] sm:$0xf0]  ;;  %v4030_v17 = vor.u32 %v4813_v14, %v4029_v12  ;;  %v3757_v23 = vld [vmem:[#allocation2 + $0x420] sm:$0xf] }
  0x4d   :  { %2011 = vmatpush.bf16.msrb.mxu2 %v4062_v54  ;;  %v4222_v18 = vor.u32 %v4861_v16, %v4221_v15  ;;  %v4773_v20 = vld [vmem:[#allocation2 + $0x50c] sm:$0xf0]  ;;  %v4013_v26 = vld [vmem:[#allocation2 + $0x620] sm:$0xf] }
  0x4e   :  { %1985 = vmatpush.bf16.msra.mxu0 %v3806_v52  ;;  %v3870_v21 = vor.u32 %v4773_v20, %v3869_v19  ;;  %v4745_v24 = vld [vmem:[#allocation2 + $0x42c] sm:$0xf0]  ;;  %v4205_v30 = vld [vmem:[#allocation2 + $0x7a0] sm:$0xf] }
  0x4f   :  { %v3758_v28 = vor.u32 %v4745_v24, %v3757_v23  ;;  %v4809_v29 = vld [vmem:[#allocation2 + $0x62c] sm:$0xf0]  ;;  %v3741_v38 = vld [vmem:[#allocation2 + $0x400] sm:$0xf] }
  0x50   :  { %1999 = vmatpush.bf16.msrb.mxu1 %v3918_v45  ;;  %2022 = vmatpush.bf16.msra.mxu3 %v4222_v18  ;;  %v4857_v31 = vld [vmem:[#allocation2 + $0x7ac] sm:$0xf0]  ;;  %v4014_v33 = vor.u32 %v4809_v29, %v4013_v26  ;;  %v3997_v40 = vld [vmem:[#allocation2 + $0x600] sm:$0xf] }
  0x51   :  { %2012 = vmatpush.bf16.msrb.mxu2 %v4046_v4  ;;  %v4206_v34 = vor.u32 %v4857_v31, %v4205_v30  ;;  %v4741_v39 = vld [vmem:[#allocation2 + $0x40c] sm:$0xf0]  ;;  %v4189_v45 = vld [vmem:[#allocation2 + $0x780] sm:$0xf] }
  0x52   :  { %1986 = vmatpush.bf16.msra.mxu0 %v3790_v0  ;;  %v3742_v43 = vor.u32 %v4741_v39, %v3741_v38  ;;  %v4805_v44 = vld [vmem:[#allocation2 + $0x60c] sm:$0xf0]  ;;  %v4157_v3 = vld [vmem:[#allocation2 + $0x740] sm:$0xf] }
  0x53   :  { %v3998_v48 = vor.u32 %v4805_v44, %v3997_v40  ;;  %v4853_v49 = vld [vmem:[#allocation2 + $0x78c] sm:$0xf0]  ;;  %v4141_v10 = vld [vmem:[#allocation2 + $0x720] sm:$0xf] }
  0x54   :  { %2000 = vmatpush.bf16.msrb.mxu1 %v3902_v57  ;;  %2023 = vmatpush.bf16.msra.mxu3 %v4206_v34  ;;  %v4190_v51 = vor.u32 %v4853_v49, %v4189_v45  ;;  %v4173_v57 = vld [vmem:[#allocation2 + $0x760] sm:$0xf]  ;;  %v4849_v58 = vld [vmem:[#allocation2 + $0x76c] sm:$0xf0] }
  0x55   :  { %2013 = vmatpush.bf16.msrb.mxu2 %v4030_v17  ;;  %v4174_v60 = vor.u32 %v4849_v58, %v4173_v57  ;;  %v4845_v4 = vld [vmem:[#allocation2 + $0x74c] sm:$0xf0]  ;;  %v95_v17 = vperm.slane %v5292_v25, 3  ;;  %v4125_v23 = vld [vmem:[#allocation2 + $0x700] sm:$0xf] }
  0x56   :  { %1987 = vmatpush.bf16.msra.mxu0 %v3774_v13  ;;  %v4158_v7 = vor.u32 %v4845_v4, %v4157_v3  ;;  %v4841_v11 = vld [vmem:[#allocation2 + $0x72c] sm:$0xf0]  ;;  %v4667_v58 = vld [vmem:[#allocation2 + $0x1c4] sm:$0xf] }
  0x57   :  { %v4142_v14 = vor.u32 %v4841_v11, %v4141_v10  ;;  %v4837_v24 = vld [vmem:[#allocation2 + $0x70c] sm:$0xf0] }
  0x58   :  { %2001 = vmatpush.bf16.msrb.mxu1 %v3886_v9  ;;  %2024 = vmatpush.bf16.msra.mxu3 %v4190_v51  ;;  %v4126_v31 = vor.u32 %v4837_v24, %v4125_v23 }
  0x59   :  { %2014 = vmatpush.bf16.msrb.mxu2 %v4014_v33 }
  0x5a   :  { %1988 = vmatpush.bf16.msra.mxu0 %v3758_v28 }
  0x5c   :  { %2002 = vmatpush.bf16.msrb.mxu1 %v3870_v21  ;;  %2025 = vmatpush.bf16.msra.mxu3 %v4174_v60  ;;  %v98_v21 = vperm.slane %v5292_v25, 6 }
  0x5d   :  { %2015 = vmatpush.bf16.msrb.mxu2 %v3998_v48  ;;  %v3471_v48 = vld [vmem:[#allocation2 + $0x1f0] sm:$0xf0] }
  0x5e   :  { %1989 = vmatpush.bf16.msra.mxu0 %v3742_v43 }
  0x60   :  { %2026 = vmatpush.bf16.msra.mxu3 %v4158_v7 }
  0x64   :  { %2027 = vmatpush.bf16.msra.mxu3 %v4142_v14  ;;  %v99_v14 = vperm.slane %v5292_v25, 7  ;;  %v3583_v25 = vld [vmem:[#allocation2 + $0x2d0] sm:$0xf0] }
  0x68   :  { %2028 = vmatpush.bf16.msra.mxu3 %v4126_v31 }
  0x94   :  { %v214_v22 = vpop.f32.mrf.mxu1 }
  0x95   :  { %v5295_v27 = vadd.f32 %v214_v22, %v93_v8 }
  0x97   :  { %v297_v35 = vmin.f32 %v5295_v27, 20.0 }
  0x99   :  { %v306_v41 = vmul.f32 1.442695, %v297_v35 }
  0x9a   :  { %v201_v42 = vpop.f32.mrf.mxu3 }
  0x9b   :  { %v5301_v46 = vadd.f32 %v201_v42, %v92_v32  ;;  %4960 = vpow2.f32 %v306_v41 }
  0x9c   :  { %v216_v53 = vpop.f32.mrf.mxu1 }
  0x9d   :  { %v227_v47 = vpop.f32.mrf.mxu2  ;;  %v296_v52 = vmin.f32 %v5301_v46, 20.0 }
  0x9e   :  { %v5303_v50 = vadd.f32 %v227_v47, %v94_v36  ;;  %v4671_v47 = vld [vmem:[#allocation2 + $0x1e4] sm:$0xf] }
  0x9f   :  { %v253_v54 = vpop.f32.mrf.mxu0  ;;  %v304_v59 = vmul.f32 1.442695, %v296_v52  ;;  %v3474_v57 = vor.u32 %v4671_v47, %v3471_v48  ;;  %v3311_v47 = vld [vmem:[#allocation2 + $0xb0] sm:$0xf0] }
  0xa0   :  { %v298_v55 = vmin.f32 %v5303_v50, 20.0  ;;  %v5307_v56 = vadd.f32 %v253_v54, %v96_v37 }
  0xa1   :  { %4962 = vpow2.f32 %v304_v59  ;;  %v4961_v0 = vpop.eup %4960 }
  0xa2   :  { %v308_v61 = vmul.f32 1.442695, %v298_v55  ;;  %v300_v62 = vmin.f32 %v5307_v56, 20.0  ;;  %v203_v1 = vpop.f32.mrf.mxu3  ;;  %v321_v5 = vadd.f32 1.0, %v4961_v0 }
  0xa4   :  { %4964 = vpow2.f32 %v308_v61  ;;  %v312_v2 = vmul.f32 1.442695, %v300_v62  ;;  %v329_v8 = vmul.f32 %v321_v5, %v321_v5  ;;  %v266_v9 = vpop.f32.mrf.mxu1  ;;  %v3455_v62 = vld [vmem:[#allocation2 + $0x1d0] sm:$0xf0]  ;;  %v4639_v5 = vld [vmem:[#allocation2 + $0xe4] sm:$0xf] }
  0xa5   :  { %v229_v6 = vpop.f32.mrf.mxu2  ;;  %v5311_v13 = vadd.f32 %v266_v9, %v97_v63  ;;  %v3599_v9 = vld [vmem:[#allocation2 + $0x2f0] sm:$0xf0] }
  0xa6   :  { %4966 = vpow2.f32 %v312_v2  ;;  %v345_v16 = vadd.f32 1.0, %v329_v8  ;;  %v3220_v36 = vadd.f32 -1.0, %v329_v8  ;;  %v3343_v6 = vld [vmem:[#allocation2 + $0xf0] sm:$0xf0]  ;;  %v4703_v8 = vld [vmem:[#allocation2 + $0x2e4] sm:$0xf] }
  0xa7   :  { %v255_v12 = vpop.f32.mrf.mxu0  ;;  %v4963_v15 = vpop.eup %4962  ;;  %v301_v20 = vmin.f32 %v5311_v13, 20.0  ;;  %v3602_v24 = vor.u32 %v4703_v8, %v3599_v9 }
  0xa8   :  { %v320_v19 = vadd.f32 1.0, %v4963_v15  ;;  %4968 = vrcp.f32 %v345_v16  ;;  %v4663_v15 = vld [vmem:[#allocation2 + $0x1a4] sm:$0xf]  ;;  %v3439_v16 = vld [vmem:[#allocation2 + $0x1b0] sm:$0xf0] }
  0xa9   :  { %v314_v29 = vmul.f32 1.442695, %v301_v20  ;;  %v4635_v20 = vld [vmem:[#allocation2 + $0xc4] sm:$0xf] }
  0xaa   :  { %v4965_v18 = vpop.eup %4964  ;;  %v328_v28 = vmul.f32 %v320_v19, %v320_v19  ;;  %v240_v30 = vpop.f32.mrf.mxu3  ;;  %v3346_v19 = vor.u32 %v4639_v5, %v3343_v6 }
  0xab   :  { %v322_v22 = vadd.f32 1.0, %v4965_v18  ;;  %v5316_v33 = vadd.f32 %v240_v30, %v95_v17  ;;  %4970 = vpow2.f32 %v314_v29  ;;  %v4699_v30 = vld [vmem:[#allocation2 + $0x2c4] sm:$0xf] }
  0xac   :  { %v4967_v26 = vpop.eup %4966  ;;  %v344_v37 = vadd.f32 1.0, %v328_v28  ;;  %v268_v41 = vpop.f32.mrf.mxu1  ;;  %v3219_v59 = vadd.f32 -1.0, %v328_v28 }
  0xad   :  { %v330_v32 = vmul.f32 %v322_v22, %v322_v22  ;;  %v324_v34 = vadd.f32 1.0, %v4967_v26  ;;  %v279_v35 = vpop.f32.mrf.mxu2  ;;  %v299_v40 = vmin.f32 %v5316_v33, 20.0 }
  0xae   :  { %v5318_v38 = vadd.f32 %v279_v35, %v98_v21  ;;  %4972 = vrcp.f32 %v344_v37  ;;  %v4969_v43 = vpop.eup %4968  ;;  %v3327_v21 = vld [vmem:[#allocation2 + $0xd0] sm:$0xf0] }
  0xaf   :  { %v346_v39 = vadd.f32 1.0, %v330_v32  ;;  %v310_v44 = vmul.f32 1.442695, %v299_v40  ;;  %v332_v45 = vmul.f32 %v324_v34, %v324_v34  ;;  %v361_v49 = vmul.f32 %v4969_v43, %v3220_v36  ;;  %v4659_v34 = vld [vmem:[#allocation2 + $0x184] sm:$0xf] }
  0xb0   :  { %v302_v42 = vmin.f32 %v5318_v38, 20.0  ;;  %v3221_v54 = vadd.f32 -1.0, %v330_v32  ;;  %v3330_v32 = vor.u32 %v4635_v20, %v3327_v21  ;;  %v3423_v40 = vld [vmem:[#allocation2 + $0x190] sm:$0xf0]  ;;  %v3586_v43 = vor.u32 %v4699_v30, %v3583_v25  ;;  %v4647_v30 = vld [vmem:[#allocation2 + $0x124] sm:$0xf] }
  0xb1   :  { %4974 = vrcp.f32 %v346_v39  ;;  %v4971_v52 = vpop.eup %4970  ;;  %v369_v53 = vmul.f32 %v361_v49, %v5295_v27  ;;  %v348_v61 = vadd.f32 1.0, %v332_v45  ;;  %v3458_v27 = vor.u32 %v4667_v58, %v3455_v62  ;;  %v4695_v49 = vld [vmem:[#allocation2 + $0x2a4] sm:$0xf]  ;;  %v3295_v62 = vld [vmem:[#allocation2 + $0x90] sm:$0xf0] }
  0xb2   :  { %v316_v51 = vmul.f32 1.442695, %v302_v42  ;;  %4976 = vpow2.f32 %v310_v44  ;;  %v242_v55 = vpop.f32.mrf.mxu3  ;;  %v325_v60 = vadd.f32 1.0, %v4971_v52  ;;  %v3223_v37 = vadd.f32 -1.0, %v332_v45  ;;  %v4631_v44 = vld [vmem:[#allocation2 + $0xa4] sm:$0xf] }
  0xb3   :  { %v5323_v1 = vpack.c.bf16 %v369_v53, %v369_v53  ;;  %v3426_v45 = vor.u32 %v4659_v34, %v3423_v40  ;;  %v4655_v58 = vld [vmem:[#allocation2 + $0x164] sm:$0xf]  ;;  %v3375_v25 = vld [vmem:[#allocation2 + $0x130] sm:$0xf0] }
  0xb4   :  { %4978 = vpow2.f32 %v316_v51  ;;  %v4973_v0 = vpop.eup %4972  ;;  %v333_v4 = vmul.f32 %v325_v60, %v325_v60  ;;  %v3567_v51 = vld [vmem:[#allocation2 + $0x2b0] sm:$0xf0] }
  0xb5   :  { %v281_v63 = vpop.f32.mrf.mxu2  ;;  %v360_v3 = vmul.f32 %v4973_v0, %v3219_v59  ;;  %1951 = vmatmul.bf16.vlgmr.msra.gmra.mxu1 %v5323_v1  ;;  %4980 = vrcp.f32 %v348_v61  ;;  %v3407_v59 = vld [vmem:[#allocation2 + $0x170] sm:$0xf0]  ;;  %v3570_v60 = vor.u32 %v4695_v49, %v3567_v51  ;;  %v4627_v61 = vld [vmem:[#allocation2 + $0x84] sm:$0xf] }
  0xb6   :  { %v349_v12 = vadd.f32 1.0, %v333_v4  ;;  %2047 = vmatpush.bf16.msra.mxu1 %v3474_v57  ;;  %v3224_v35 = vadd.f32 -1.0, %v333_v4  ;;  %v3314_v57 = vor.u32 %v4631_v44, %v3311_v47  ;;  %v3410_v6 = vor.u32 %v4655_v58, %v3407_v59  ;;  %v3263_v40 = vld [vmem:[#allocation2 + $0x50] sm:$0xf0]  ;;  %v4643_v47 = vld [vmem:[#allocation2 + $0x104] sm:$0xf] }
  0xb7   :  { %v4975_v2 = vpop.eup %4974  ;;  %v368_v11 = vmul.f32 %v360_v3, %v5301_v46  ;;  %v3551_v3 = vld [vmem:[#allocation2 + $0x290] sm:$0xf0]  ;;  %v3298_v9 = vor.u32 %v4627_v61, %v3295_v62  ;;  %v4799_v51 = vld [vmem:[#allocation2 + $0x5e4] sm:$0xf] }
  0xb8   :  { %v362_v7 = vmul.f32 %v4975_v2, %v3221_v54  ;;  %v4977_v10 = vpop.eup %4976  ;;  %4982 = vrcp.f32 %v349_v12  ;;  %v4691_v2 = vld [vmem:[#allocation2 + $0x284] sm:$0xf]  ;;  %v3519_v44 = vld [vmem:[#allocation2 + $0x250] sm:$0xf0] }
  0xb9   :  { %v323_v18 = vadd.f32 1.0, %v4977_v10  ;;  %v5329_v23 = vpack.c.bf16 %v368_v11, %v368_v11  ;;  %v4651_v10 = vld [vmem:[#allocation2 + $0x144] sm:$0xf]  ;;  %v3391_v11 = vld [vmem:[#allocation2 + $0x150] sm:$0xf0] }
  0xba   :  { %v370_v17 = vmul.f32 %v362_v7, %v5303_v50  ;;  %v4979_v22 = vpop.eup %4978  ;;  %v292_v29 = vpop.f32.mrf.mxu3  ;;  %2048 = vmatpush.bf16.msra.mxu1 %v3458_v27  ;;  %v3442_v50 = vor.u32 %v4663_v15, %v3439_v16  ;;  %v3727_v15 = vld [vmem:[#allocation2 + $0x3f0] sm:$0xf0] }
  0xbb   :  { %v331_v46 = vmul.f32 %v323_v18, %v323_v18  ;;  %v326_v28 = vadd.f32 1.0, %v4979_v22  ;;  %v5333_v31 = vadd.f32 %v292_v29, %v99_v14  ;;  %1938 = vmatmul.bf16.vlgmr.msrb.gmra.mxu0 %v5329_v23  ;;  %v4981_v41 = vpop.eup %4980  ;;  %v3554_v14 = vor.u32 %v4691_v2, %v3551_v3  ;;  %v3279_v18 = vld [vmem:[#allocation2 + $0x70] sm:$0xf0]  ;;  %v4687_v22 = vld [vmem:[#allocation2 + $0x264] sm:$0xf] }
  0xbc   :  { %v5331_v26 = vpack.c.bf16 %v370_v17, %v370_v17  ;;  %2034 = vmatpush.bf16.msrb.mxu0 %v3346_v19  ;;  %v364_v55 = vmul.f32 %v4981_v41, %v3223_v37  ;;  %v4623_v17 = vld [vmem:[#allocation2 + $0x64] sm:$0xf]  ;;  %v3359_v49 = vld [vmem:[#allocation2 + $0x110] sm:$0xf0] }
  0xbd   :  { %v347_v36 = vadd.f32 1.0, %v331_v46  ;;  %v334_v39 = vmul.f32 %v326_v28, %v326_v28  ;;  %v303_v42 = vmin.f32 %v5333_v31, 20.0  ;;  %v3222_v4 = vadd.f32 -1.0, %v331_v46  ;;  %v3247_v58 = vld [vmem:[#allocation2 + $0x30] sm:$0xf0] }
  0xbe   :  { %1964 = vmatmul.bf16.vlgmr.msra.gmra.mxu2 %v5331_v26  ;;  %v4983_v52 = vpop.eup %4982  ;;  %2049 = vmatpush.bf16.msra.mxu1 %v3442_v50  ;;  %v372_v8 = vmul.f32 %v364_v55, %v5307_v56  ;;  %v3394_v56 = vor.u32 %v4651_v10, %v3391_v11  ;;  %v3282_v34 = vor.u32 %v4623_v17, %v3279_v18  ;;  %v3503_v61 = vld [vmem:[#allocation2 + $0x230] sm:$0xf0]  ;;  %v4675_v10 = vld [vmem:[#allocation2 + $0x204] sm:$0xf] }
  0xbf   :  { %2060 = vmatpush.bf16.msra.mxu2 %v3602_v24  ;;  %4984 = vrcp.f32 %v347_v36  ;;  %v350_v48 = vadd.f32 1.0, %v334_v39  ;;  %v318_v53 = vmul.f32 1.442695, %v303_v42  ;;  %v365_v54 = vmul.f32 %v4983_v52, %v3224_v35  ;;  %v3535_v24 = vld [vmem:[#allocation2 + $0x270] sm:$0xf0] }
  0xc0   :  { %2035 = vmatpush.bf16.msrb.mxu0 %v3330_v32  ;;  %v3225_v5 = vadd.f32 -1.0, %v334_v39  ;;  %v5344_v46 = vpack.c.bf16 %v372_v8, %v372_v8  ;;  %v4731_v35 = vld [vmem:[#allocation2 + $0x3c4] sm:$0xf]  ;;  %v3538_v37 = vor.u32 %v4687_v22, %v3535_v24  ;;  %v3378_v42 = vor.u32 %v4647_v30, %v3375_v25  ;;  %v3967_v2 = vld [vmem:[#allocation2 + $0x5d0] sm:$0xf0] }
  0xc1   :  { %4986 = vrcp.f32 %v350_v48  ;;  %v373_v63 = vmul.f32 %v365_v54, %v5311_v13  ;;  %v4735_v13 = vld [vmem:[#allocation2 + $0x3e4] sm:$0xf]  ;;  %v3695_v54 = vld [vmem:[#allocation2 + $0x3b0] sm:$0xf0]  ;;  %v3362_v59 = vor.u32 %v4643_v47, %v3359_v49 }
  0xc2   :  { %4988 = vpow2.f32 %v318_v53  ;;  %v294_v0 = vpop.f32.mrf.mxu3  ;;  %2050 = vmatpush.bf16.msra.mxu1 %v3426_v45  ;;  %v3730_v29 = vor.u32 %v4735_v13, %v3727_v15  ;;  %v4619_v39 = vld [vmem:[#allocation2 + $0x44] sm:$0xf]  ;;  %v3983_v53 = vld [vmem:[#allocation2 + $0x5f0] sm:$0xf0] }
  0xc3   :  { %2061 = vmatpush.bf16.msra.mxu2 %v3586_v43  ;;  %v5339_v27 = vpack.c.bf16 %v373_v63, %v373_v63  ;;  %v4683_v43 = vld [vmem:[#allocation2 + $0x244] sm:$0xf]  ;;  %v3266_v52 = vor.u32 %v4619_v39, %v3263_v40  ;;  %v3986_v62 = vor.u32 %v4799_v51, %v3983_v53  ;;  %v3487_v11 = vld [vmem:[#allocation2 + $0x210] sm:$0xf0] }
  0xc4   :  { %2036 = vmatpush.bf16.msrb.mxu0 %v3314_v57  ;;  %v4727_v45 = vld [vmem:[#allocation2 + $0x3a4] sm:$0xf]  ;;  %v3522_v55 = vor.u32 %v4683_v43, %v3519_v44  ;;  %v4111_v18 = vld [vmem:[#allocation2 + $0x6f0] sm:$0xf0]  ;;  %v3490_v22 = vor.u32 %v4675_v10, %v3487_v11 }
  0xc5   :  { %v4985_v7 = vpop.eup %4984  ;;  %2003 = vmatmul.bf16.vlgmr.msrb.gmra.mxu1 %v5339_v27  ;;  %v4615_v57 = vld [vmem:[#allocation2 + $0x24] sm:$0xf]  ;;  %v3698_v63 = vor.u32 %v4727_v45, %v3695_v54  ;;  %v3647_v47 = vld [vmem:[#allocation2 + $0x350] sm:$0xf0] }
  0xc6   :  { %v363_v12 = vmul.f32 %v4985_v7, %v3222_v4  ;;  %2051 = vmatpush.bf16.msra.mxu1 %v3410_v6  ;;  %v4795_v0 = vld [vmem:[#allocation2 + $0x5c4] sm:$0xf]  ;;  %v3250_v4 = vor.u32 %v4615_v57, %v3247_v58  ;;  %v3679_v6 = vld [vmem:[#allocation2 + $0x390] sm:$0xf0] }
  0xc7   :  { %2062 = vmatpush.bf16.msra.mxu2 %v3570_v60  ;;  %v4987_v16 = vpop.eup %4986  ;;  %v4679_v60 = vld [vmem:[#allocation2 + $0x224] sm:$0xf]  ;;  %v3970_v15 = vor.u32 %v4795_v0, %v3967_v2  ;;  %v3919_v54 = vld [vmem:[#allocation2 + $0x570] sm:$0xf0] }
  0xc8   :  { %v4989_v19 = vpop.eup %4988  ;;  %v371_v20 = vmul.f32 %v363_v12, %v5316_v33  ;;  %v366_v21 = vmul.f32 %v4987_v16, %v3225_v5  ;;  %2037 = vmatpush.bf16.msrb.mxu0 %v3298_v9  ;;  %v3711_v33 = vld [vmem:[#allocation2 + $0x3d0] sm:$0xf0]  ;;  %v4723_v5 = vld [vmem:[#allocation2 + $0x384] sm:$0xf]  ;;  %v3506_v7 = vor.u32 %v4679_v60, %v3503_v61 }
  0xc9   :  { %v327_v28 = vadd.f32 1.0, %v4989_v19  ;;  %v4611_v8 = vld [vmem:[#allocation2 + $0x4] sm:$0xf]  ;;  %v3231_v9 = vld [vmem:[#allocation2 + $0x10] sm:$0xf0]  ;;  %v3682_v16 = vor.u32 %v4723_v5, %v3679_v6 }
  0xca   :  { %v5346_v50 = vpack.c.bf16 %v371_v20, %v371_v20  ;;  %v374_v32 = vmul.f32 %v366_v21, %v5318_v38  ;;  %2052 = vmatpush.bf16.msra.mxu1 %v3394_v56  ;;  %v3714_v38 = vor.u32 %v4731_v35, %v3711_v33  ;;  %v4767_v12 = vld [vmem:[#allocation2 + $0x4e4] sm:$0xf]  ;;  %v3234_v20 = vor.u32 %v4611_v8, %v3231_v9  ;;  %v3951_v56 = vld [vmem:[#allocation2 + $0x5b0] sm:$0xf0] }
  0xcb   :  { %2063 = vmatpush.bf16.msra.mxu2 %v3554_v14  ;;  %v335_v36 = vmul.f32 %v327_v28, %v327_v28  ;;  %1990 = vmatmul.bf16.vlgmr.msra.gmra.mxu0 %v5344_v46  ;;  %v3855_v14 = vld [vmem:[#allocation2 + $0x4f0] sm:$0xf0]  ;;  %v4831_v17 = vld [vmem:[#allocation2 + $0x6e4] sm:$0xf] }
  0xcc   :  { %v5349_v41 = vpack.c.bf16 %v374_v32, %v374_v32  ;;  %1977 = vmatmul.bf16.vlgmr.msrb.gmra.mxu3 %v5346_v50  ;;  %2038 = vmatpush.bf16.msrb.mxu0 %v3282_v34  ;;  %v4791_v21 = vld [vmem:[#allocation2 + $0x5a4] sm:$0xf]  ;;  %v3858_v24 = vor.u32 %v4767_v12, %v3855_v14  ;;  %v4114_v25 = vor.u32 %v4831_v17, %v4111_v18  ;;  %v3839_v34 = vld [vmem:[#allocation2 + $0x4d0] sm:$0xf0] }
  0xcd   :  { %v351_v48 = vadd.f32 1.0, %v335_v36  ;;  %2073 = vmatpush.bf16.msrb.mxu3 %v3730_v29  ;;  %v3226_v3 = vadd.f32 -1.0, %v335_v36  ;;  %v4719_v28 = vld [vmem:[#allocation2 + $0x364] sm:$0xf]  ;;  %v3663_v29 = vld [vmem:[#allocation2 + $0x370] sm:$0xf0]  ;;  %v3954_v35 = vor.u32 %v4791_v21, %v3951_v56 }
  0xce   :  { %2016 = vmatmul.bf16.vlgmr.msrb.gmra.mxu2 %v5349_v41  ;;  %2053 = vmatpush.bf16.msra.mxu1 %v3378_v42  ;;  %v4763_v32 = vld [vmem:[#allocation2 + $0x4c4] sm:$0xf]  ;;  %v4095_v36 = vld [vmem:[#allocation2 + $0x6d0] sm:$0xf0]  ;;  %v3666_v39 = vor.u32 %v4719_v28, %v3663_v29 }
  0xcf   :  { %4990 = vrcp.f32 %v351_v48  ;;  %2064 = vmatpush.bf16.msra.mxu2 %v3538_v37  ;;  %v4827_v33 = vld [vmem:[#allocation2 + $0x6c4] sm:$0xf]  ;;  %v3935_v42 = vld [vmem:[#allocation2 + $0x590] sm:$0xf0]  ;;  %v3842_v43 = vor.u32 %v4763_v32, %v3839_v34 }
  0xd0   :  { %2039 = vmatpush.bf16.msrb.mxu0 %v3266_v52  ;;  %v4787_v40 = vld [vmem:[#allocation2 + $0x584] sm:$0xf]  ;;  %v4079_v52 = vld [vmem:[#allocation2 + $0x6b0] sm:$0xf0] }
  0xd1   :  { %2074 = vmatpush.bf16.msrb.mxu3 %v3714_v38  ;;  %v4715_v44 = vld [vmem:[#allocation2 + $0x344] sm:$0xf]  ;;  %v3823_v38 = vld [vmem:[#allocation2 + $0x4b0] sm:$0xf0]  ;;  %v3938_v49 = vor.u32 %v4787_v40, %v3935_v42 }
  0xd2   :  { %2054 = vmatpush.bf16.msra.mxu1 %v3362_v59  ;;  %v4759_v48 = vld [vmem:[#allocation2 + $0x4a4] sm:$0xf]  ;;  %v3650_v53 = vor.u32 %v4715_v44, %v3647_v47  ;;  %v3631_v58 = vld [vmem:[#allocation2 + $0x330] sm:$0xf0] }
  0xd3   :  { %2065 = vmatpush.bf16.msra.mxu2 %v3522_v55  ;;  %v4823_v51 = vld [vmem:[#allocation2 + $0x6a4] sm:$0xf]  ;;  %v3826_v55 = vor.u32 %v4759_v48, %v3823_v38  ;;  %v3807_v61 = vld [vmem:[#allocation2 + $0x490] sm:$0xf0] }
  0xd4   :  { %2040 = vmatpush.bf16.msrb.mxu0 %v3250_v4  ;;  %v4783_v45 = vld [vmem:[#allocation2 + $0x564] sm:$0xf]  ;;  %v4082_v59 = vor.u32 %v4823_v51, %v4079_v52  ;;  %v4063_v0 = vld [vmem:[#allocation2 + $0x690] sm:$0xf0]  ;;  %v3461_v51 = vld [vmem:[#allocation2 + $0x1c8] sm:$0xf] }
  0xd5   :  { %v4991_v13 = vpop.eup %4990  ;;  %2075 = vmatpush.bf16.msrb.mxu3 %v3698_v63  ;;  %2055 = vmatmul.bf16.vlgmr.msra.gmra.mxu1 %v5323_v1  ;;  %v4711_v57 = vld [vmem:[#allocation2 + $0x324] sm:$0xf]  ;;  %v3903_v4 = vld [vmem:[#allocation2 + $0x550] sm:$0xf0] }
  0xd6   :  { %2099 = vmatpush.bf16.msrb.mxu1 %v3986_v62  ;;  %v367_v19 = vmul.f32 %v4991_v13, %v3226_v3  ;;  %v4755_v60 = vld [vmem:[#allocation2 + $0x484] sm:$0xf]  ;;  %v3922_v62 = vor.u32 %v4783_v45, %v3919_v54  ;;  %v3634_v2 = vor.u32 %v4711_v57, %v3631_v58  ;;  %v3791_v10 = vld [vmem:[#allocation2 + $0x470] sm:$0xf0]  ;;  %v4670_v45 = vld [vmem:[#allocation2 + $0x1d4] sm:$0xf0] }
  0xd7   :  { %2066 = vmatpush.bf16.msra.mxu2 %v3506_v7  ;;  %v4819_v63 = vld [vmem:[#allocation2 + $0x684] sm:$0xf]  ;;  %v3810_v5 = vor.u32 %v4755_v60, %v3807_v61  ;;  %v3615_v7 = vld [vmem:[#allocation2 + $0x310] sm:$0xf0] }
  0xd8   :  { %v375_v30 = vmul.f32 %v367_v19, %v5333_v31  ;;  %2041 = vmatpush.bf16.msrb.mxu0 %v3234_v20  ;;  %v4098_v31 = vor.u32 %v4827_v33, %v4095_v36  ;;  %v4779_v3 = vld [vmem:[#allocation2 + $0x544] sm:$0xf]  ;;  %v4066_v9 = vor.u32 %v4819_v63, %v4063_v0  ;;  %v4239_v12 = vld [vmem:[#allocation2 + $0x7f0] sm:$0xf0]  ;;  %v3477_v36 = vld [vmem:[#allocation2 + $0x1e8] sm:$0xf]  ;;  %v3462_v0 = vor.u32 %v4670_v45, %v3461_v51 }
  0xd9   :  { %2076 = vmatpush.bf16.msrb.mxu3 %v3682_v16  ;;  %v4707_v6 = vld [vmem:[#allocation2 + $0x304] sm:$0xf]  ;;  %v3906_v14 = vor.u32 %v4779_v3, %v3903_v4  ;;  %v3887_v18 = vld [vmem:[#allocation2 + $0x530] sm:$0xf0]  ;;  %v4642_v63 = vld [vmem:[#allocation2 + $0xf4] sm:$0xf0] }
  0xda   :  { %2100 = vmatpush.bf16.msrb.mxu1 %v3970_v15  ;;  %v5356_v37 = vpack.c.bf16 %v375_v30, %v375_v30  ;;  %v4751_v8 = vld [vmem:[#allocation2 + $0x464] sm:$0xf]  ;;  %v4047_v15 = vld [vmem:[#allocation2 + $0x670] sm:$0xf0]  ;;  %v3618_v16 = vor.u32 %v4707_v6, %v3615_v7  ;;  %v4706_v3 = vld [vmem:[#allocation2 + $0x2f4] sm:$0xf0] }
  0xdb   :  { %2067 = vmatpush.bf16.msra.mxu2 %v3490_v22  ;;  %2042 = vmatmul.bf16.vlgmr.msrb.gmra.mxu0 %v5329_v23  ;;  %v4863_v11 = vld [vmem:[#allocation2 + $0x7e4] sm:$0xf]  ;;  %v3794_v19 = vor.u32 %v4751_v8, %v3791_v10  ;;  %v3775_v22 = vld [vmem:[#allocation2 + $0x450] sm:$0xf0]  ;;  %v3445_v6 = vld [vmem:[#allocation2 + $0x1a8] sm:$0xf] }
  0xdc   :  { %2086 = vmatpush.bf16.msra.mxu0 %v3858_v24  ;;  %2029 = vmatmul.bf16.vlgmr.msra.gmra.mxu3 %v5356_v37  ;;  %v4815_v13 = vld [vmem:[#allocation2 + $0x664] sm:$0xf]  ;;  %v4242_v20 = vor.u32 %v4863_v11, %v4239_v12  ;;  %v4223_v28 = vld [vmem:[#allocation2 + $0x7d0] sm:$0xf0]  ;;  %v4666_v7 = vld [vmem:[#allocation2 + $0x1b4] sm:$0xf0] }
  0xdd   :  { %2077 = vmatpush.bf16.msrb.mxu3 %v3666_v39  ;;  %v4775_v17 = vld [vmem:[#allocation2 + $0x524] sm:$0xf]  ;;  %v4050_v56 = vor.u32 %v4815_v13, %v4047_v15  ;;  %v3871_v34 = vld [vmem:[#allocation2 + $0x510] sm:$0xf0]  ;;  %v4674_v39 = vld [vmem:[#allocation2 + $0x1f4] sm:$0xf0]  ;;  %v3446_v15 = vor.u32 %v4666_v7, %v3445_v6 }
  0xde   :  { %2101 = vmatpush.bf16.msrb.mxu1 %v3954_v35  ;;  %2068 = vmatmul.bf16.vlgmr.msra.gmra.mxu2 %v5331_v26  ;;  %v4747_v21 = vld [vmem:[#allocation2 + $0x444] sm:$0xf]  ;;  %v3890_v29 = vor.u32 %v4775_v17, %v3887_v18  ;;  %v4207_v47 = vld [vmem:[#allocation2 + $0x7b0] sm:$0xf0]  ;;  %v4638_v13 = vld [vmem:[#allocation2 + $0xd4] sm:$0xf0] }
  0xdf   :  { %2112 = vmatpush.bf16.msrb.mxu2 %v4114_v25  ;;  %v4859_v24 = vld [vmem:[#allocation2 + $0x7c4] sm:$0xf]  ;;  %v4031_v25 = vld [vmem:[#allocation2 + $0x650] sm:$0xf0]  ;;  %v3778_v35 = vor.u32 %v4747_v21, %v3775_v22  ;;  %v4702_v17 = vld [vmem:[#allocation2 + $0x2d4] sm:$0xf0] }
  0xe0   :  { %2087 = vmatpush.bf16.msra.mxu0 %v3842_v43  ;;  %v4811_v30 = vld [vmem:[#allocation2 + $0x644] sm:$0xf]  ;;  %v4226_v33 = vor.u32 %v4859_v24, %v4223_v28  ;;  %v3759_v43 = vld [vmem:[#allocation2 + $0x430] sm:$0xf0]  ;;  %v3317_v28 = vld [vmem:[#allocation2 + $0xa8] sm:$0xf] }
  0xe1   :  { %2078 = vmatpush.bf16.msrb.mxu3 %v3650_v53  ;;  %v4771_v32 = vld [vmem:[#allocation2 + $0x504] sm:$0xf]  ;;  %v4034_v42 = vor.u32 %v4811_v30, %v4031_v25  ;;  %v4015_v38 = vld [vmem:[#allocation2 + $0x630] sm:$0xf0]  ;;  %v3573_v25 = vld [vmem:[#allocation2 + $0x2a8] sm:$0xf] }
  0xe2   :  { %2102 = vmatpush.bf16.msrb.mxu1 %v3938_v49  ;;  %v4743_v40 = vld [vmem:[#allocation2 + $0x424] sm:$0xf]  ;;  %v3478_v49 = vor.u32 %v4674_v39, %v3477_v36  ;;  %v4191_v60 = vld [vmem:[#allocation2 + $0x790] sm:$0xf0]  ;;  %v4654_v51 = vld [vmem:[#allocation2 + $0x154] sm:$0xf0] }
  0xe3   :  { %2113 = vmatpush.bf16.msrb.mxu2 %v4098_v31  ;;  %v4855_v44 = vld [vmem:[#allocation2 + $0x7a4] sm:$0xf]  ;;  %v3874_v31 = vor.u32 %v4771_v32, %v3871_v34  ;;  %v3762_v52 = vor.u32 %v4743_v40, %v3759_v43  ;;  %v3999_v61 = vld [vmem:[#allocation2 + $0x610] sm:$0xf0]  ;;  %v4698_v32 = vld [vmem:[#allocation2 + $0x2b4] sm:$0xf0] }
  0xe4   :  { %2088 = vmatpush.bf16.msra.mxu0 %v3826_v55  ;;  %v4807_v48 = vld [vmem:[#allocation2 + $0x624] sm:$0xf]  ;;  %v4210_v53 = vor.u32 %v4855_v44, %v4207_v47  ;;  %v3743_v55 = vld [vmem:[#allocation2 + $0x410] sm:$0xf0]  ;;  %v3301_v43 = vld [vmem:[#allocation2 + $0x88] sm:$0xf] }
  0xe5   :  { %2079 = vmatpush.bf16.msrb.mxu3 %v3634_v2  ;;  %v4739_v54 = vld [vmem:[#allocation2 + $0x404] sm:$0xf]  ;;  %v4018_v57 = vor.u32 %v4807_v48, %v4015_v38  ;;  %v3605_v2 = vld [vmem:[#allocation2 + $0x2e8] sm:$0xf]  ;;  %v4175_v11 = vld [vmem:[#allocation2 + $0x770] sm:$0xf0] }
  0xe6   :  { %2103 = vmatpush.bf16.msrb.mxu1 %v3922_v62  ;;  %v4803_v58 = vld [vmem:[#allocation2 + $0x604] sm:$0xf]  ;;  %v3349_v62 = vld [vmem:[#allocation2 + $0xe8] sm:$0xf]  ;;  %v3746_v4 = vor.u32 %v4739_v54, %v3743_v55  ;;  %v3606_v12 = vor.u32 %v4706_v3, %v3605_v2  ;;  %v4159_v22 = vld [vmem:[#allocation2 + $0x750] sm:$0xf0] }
  0xe7   :  { %2114 = vmatpush.bf16.msrb.mxu2 %v4082_v59  ;;  %v4851_v59 = vld [vmem:[#allocation2 + $0x784] sm:$0xf]  ;;  %v4002_v8 = vor.u32 %v4803_v58, %v3999_v61  ;;  %v4143_v40 = vld [vmem:[#allocation2 + $0x730] sm:$0xf0]  ;;  %v4630_v44 = vld [vmem:[#allocation2 + $0x94] sm:$0xf0] }
  0xe8   :  { %2089 = vmatpush.bf16.msra.mxu0 %v3810_v5  ;;  %v4194_v5 = vor.u32 %v4851_v59, %v4191_v60  ;;  %v4847_v10 = vld [vmem:[#allocation2 + $0x764] sm:$0xf]  ;;  %v4694_v48 = vld [vmem:[#allocation2 + $0x294] sm:$0xf0]  ;;  %v4127_v45 = vld [vmem:[#allocation2 + $0x710] sm:$0xf0] }
  0xe9   :  { %2080 = vmatpush.bf16.msrb.mxu3 %v3618_v16  ;;  %v3589_v16 = vld [vmem:[#allocation2 + $0x2c8] sm:$0xf]  ;;  %v4178_v18 = vor.u32 %v4847_v10, %v4175_v11  ;;  %v4839_v39 = vld [vmem:[#allocation2 + $0x724] sm:$0xf]  ;;  %v4738_v59 = vld [vmem:[#allocation2 + $0x3f4] sm:$0xf0] }
  0xea   :  { %2104 = vmatpush.bf16.msrb.mxu1 %v3906_v14  ;;  %v3333_v14 = vld [vmem:[#allocation2 + $0xc8] sm:$0xf]  ;;  %v3590_v24 = vor.u32 %v4702_v17, %v3589_v16  ;;  %v4146_v38 = vor.u32 %v4839_v39, %v4143_v40  ;;  %v4650_v2 = vld [vmem:[#allocation2 + $0x134] sm:$0xf0] }
  0xeb   :  { %2115 = vmatpush.bf16.msrb.mxu2 %v4066_v9  ;;  %v3350_v9 = vor.u32 %v4642_v63, %v3349_v62  ;;  %v3334_v21 = vor.u32 %v4638_v13, %v3333_v14  ;;  %v3285_v54 = vld [vmem:[#allocation2 + $0x68] sm:$0xf]  ;;  %v4690_v62 = vld [vmem:[#allocation2 + $0x274] sm:$0xf0] }
  0xec   :  { %2090 = vmatpush.bf16.msra.mxu0 %v3794_v19  ;;  %2081 = vmatmul.bf16.vlgmr.msrb.gmra.mxu3 %v5346_v50  ;;  %v3429_v19 = vld [vmem:[#allocation2 + $0x188] sm:$0xf]  ;;  %v4622_v7 = vld [vmem:[#allocation2 + $0x54] sm:$0xf0] }
  0xed   :  { %2125 = vmatpush.bf16.msra.mxu3 %v4242_v20  ;;  %v4662_v20 = vld [vmem:[#allocation2 + $0x194] sm:$0xf0]  ;;  %v3733_v58 = vld [vmem:[#allocation2 + $0x3e8] sm:$0xf] }
  0xee   :  { %2105 = vmatpush.bf16.msrb.mxu1 %v3890_v29  ;;  %v4634_v29 = vld [vmem:[#allocation2 + $0xb4] sm:$0xf0]  ;;  %v3430_v30 = vor.u32 %v4662_v20, %v3429_v19  ;;  %v3541_v61 = vld [vmem:[#allocation2 + $0x268] sm:$0xf] }
  0xef   :  { %2116 = vmatpush.bf16.msrb.mxu2 %v4050_v56  ;;  %v4843_v56 = vld [vmem:[#allocation2 + $0x744] sm:$0xf]  ;;  %v3318_v36 = vor.u32 %v4634_v29, %v3317_v28  ;;  %v3542_v6 = vor.u32 %v4690_v62, %v3541_v61  ;;  %v3525_v11 = vld [vmem:[#allocation2 + $0x248] sm:$0xf]  ;;  %v4646_v13 = vld [vmem:[#allocation2 + $0x114] sm:$0xf0] }
  0xf0   :  { %2091 = vmatpush.bf16.msra.mxu0 %v3778_v35  ;;  %v4162_v34 = vor.u32 %v4843_v56, %v4159_v22  ;;  %v3413_v35 = vld [vmem:[#allocation2 + $0x168] sm:$0xf]  ;;  %v4730_v22 = vld [vmem:[#allocation2 + $0x3b4] sm:$0xf0] }
  0xf1   :  { %2126 = vmatpush.bf16.msra.mxu3 %v4226_v33  ;;  %v4658_v33 = vld [vmem:[#allocation2 + $0x174] sm:$0xf0]  ;;  %v3365_v14 = vld [vmem:[#allocation2 + $0x108] sm:$0xf] }
  0xf2   :  { %2106 = vmatpush.bf16.msrb.mxu1 %v3874_v31  ;;  %v3414_v47 = vor.u32 %v4658_v33, %v3413_v35  ;;  %v3557_v31 = vld [vmem:[#allocation2 + $0x288] sm:$0xf]  ;;  %v4682_v29 = vld [vmem:[#allocation2 + $0x234] sm:$0xf0] }
  0xf3   :  { %2117 = vmatpush.bf16.msrb.mxu2 %v4034_v42  ;;  %v3574_v42 = vor.u32 %v4698_v32, %v3573_v25  ;;  %v3558_v55 = vor.u32 %v4694_v48, %v3557_v31  ;;  %v3989_v17 = vld [vmem:[#allocation2 + $0x5e8] sm:$0xf]  ;;  %v4798_v35 = vld [vmem:[#allocation2 + $0x5d4] sm:$0xf0] }
  0xf4   :  { %2092 = vmatpush.bf16.msra.mxu0 %v3762_v52  ;;  %v3302_v52 = vor.u32 %v4630_v44, %v3301_v43  ;;  %v3253_v19 = vld [vmem:[#allocation2 + $0x28] sm:$0xf]  ;;  %v4726_v43 = vld [vmem:[#allocation2 + $0x394] sm:$0xf0] }
  0xf5   :  { %2127 = vmatpush.bf16.msra.mxu3 %v4210_v53  ;;  %2107 = vmatmul.bf16.vlgmr.msrb.gmra.mxu1 %v5339_v27  ;;  %v4835_v53 = vld [vmem:[#allocation2 + $0x704] sm:$0xf]  ;;  %v3701_v56 = vld [vmem:[#allocation2 + $0x3a8] sm:$0xf]  ;;  %v4678_v44 = vld [vmem:[#allocation2 + $0x214] sm:$0xf0] }
  0xf6   :  { %2151 = vmatpush.bf16.msra.mxu1 %v3478_v49  ;;  %v3397_v49 = vld [vmem:[#allocation2 + $0x148] sm:$0xf]  ;;  %v4130_v63 = vor.u32 %v4835_v53, %v4127_v45  ;;  %v4770_v31 = vld [vmem:[#allocation2 + $0x4f4] sm:$0xf0] }
  0xf7   :  { %2118 = vmatpush.bf16.msrb.mxu2 %v4018_v57  ;;  %v4626_v57 = vld [vmem:[#allocation2 + $0x74] sm:$0xf0]  ;;  %v3398_v60 = vor.u32 %v4654_v51, %v3397_v49  ;;  %v3509_v28 = vld [vmem:[#allocation2 + $0x228] sm:$0xf] }
  0xf8   :  { %2093 = vmatpush.bf16.msra.mxu0 %v3746_v4  ;;  %v3286_v3 = vor.u32 %v4626_v57, %v3285_v54  ;;  %v3734_v4 = vor.u32 %v4738_v59, %v3733_v58  ;;  %v3973_v25 = vld [vmem:[#allocation2 + $0x5c8] sm:$0xf]  ;;  %v3510_v39 = vor.u32 %v4682_v29, %v3509_v28  ;;  %v4834_v49 = vld [vmem:[#allocation2 + $0x6f4] sm:$0xf0] }
  0xf9   :  { %2128 = vmatpush.bf16.msra.mxu3 %v4194_v5  ;;  %v3269_v5 = vld [vmem:[#allocation2 + $0x48] sm:$0xf]  ;;  %v3974_v48 = vor.u32 %v4798_v35, %v3973_v25  ;;  %v4794_v45 = vld [vmem:[#allocation2 + $0x5b4] sm:$0xf0] }
  0xfa   :  { %2152 = vmatpush.bf16.msra.mxu1 %v3462_v0  ;;  %v3381_v0 = vld [vmem:[#allocation2 + $0x128] sm:$0xf]  ;;  %v4722_v58 = vld [vmem:[#allocation2 + $0x374] sm:$0xf0] }
  0xfb   :  { %2119 = vmatpush.bf16.msrb.mxu2 %v4002_v8  ;;  %2094 = vmatmul.bf16.vlgmr.msra.gmra.mxu0 %v5344_v46  ;;  %v3717_v8 = vld [vmem:[#allocation2 + $0x3c8] sm:$0xf]  ;;  %v3382_v10 = vor.u32 %v4650_v2, %v3381_v0  ;;  %v4766_v61 = vld [vmem:[#allocation2 + $0x4d4] sm:$0xf0] }
  0xfc   :  { %2138 = vmatpush.bf16.msrb.mxu0 %v3350_v9  ;;  %v4734_v9 = vld [vmem:[#allocation2 + $0x3d4] sm:$0xf0]  ;;  %v3237_v33 = vld [vmem:[#allocation2 + $0x8] sm:$0xf] }
  0xfd   :  { %2129 = vmatpush.bf16.msra.mxu3 %v4178_v18  ;;  %v3718_v16 = vor.u32 %v4734_v9, %v3717_v8  ;;  %v4802_v18 = vld [vmem:[#allocation2 + $0x5f4] sm:$0xf0]  ;;  %v3493_v40 = vld [vmem:[#allocation2 + $0x208] sm:$0xf] }
  0xfe   :  { %2153 = vmatpush.bf16.msra.mxu1 %v3446_v15  ;;  %2120 = vmatmul.bf16.vlgmr.msrb.gmra.mxu2 %v5349_v41  ;;  %v3270_v15 = vor.u32 %v4622_v7, %v3269_v5  ;;  %v3957_v53 = vld [vmem:[#allocation2 + $0x5a8] sm:$0xf]  ;;  %v3494_v54 = vor.u32 %v4678_v44, %v3493_v40  ;;  %v4830_v0 = vld [vmem:[#allocation2 + $0x6d4] sm:$0xf0] }
  0xff   :  { %2164 = vmatpush.bf16.msra.mxu2 %v3606_v12  ;;  %v4686_v12 = vld [vmem:[#allocation2 + $0x254] sm:$0xf0]  ;;  %v3669_v57 = vld [vmem:[#allocation2 + $0x368] sm:$0xf]  ;;  %v3958_v62 = vor.u32 %v4794_v45, %v3957_v53 }
 0x100   :  { %2139 = vmatpush.bf16.msrb.mxu0 %v3334_v21  ;;  %v3526_v20 = vor.u32 %v4686_v12, %v3525_v11  ;;  %v4618_v21 = vld [vmem:[#allocation2 + $0x34] sm:$0xf0]  ;;  %v3670_v2 = vor.u32 %v4722_v58, %v3669_v57  ;;  %v3829_v9 = vld [vmem:[#allocation2 + $0x4a8] sm:$0xf] }
 0x101   :  { %2130 = vmatpush.bf16.msra.mxu3 %v4162_v34  ;;  %v3254_v32 = vor.u32 %v4618_v21, %v3253_v19  ;;  %v3702_v34 = vor.u32 %v4730_v22, %v3701_v56  ;;  %v4718_v7 = vld [vmem:[#allocation2 + $0x354] sm:$0xf0]  ;;  %v4085_v12 = vld [vmem:[#allocation2 + $0x6a8] sm:$0xf] }
 0x102   :  { %2154 = vmatpush.bf16.msra.mxu1 %v3430_v30  ;;  %v3990_v30 = vor.u32 %v4802_v18, %v3989_v17  ;;  %v3637_v18 = vld [vmem:[#allocation2 + $0x328] sm:$0xf]  ;;  %v4714_v19 = vld [vmem:[#allocation2 + $0x334] sm:$0xf0] }
 0x103   :  { %2165 = vmatpush.bf16.msra.mxu2 %v3590_v24  ;;  %v3366_v24 = vor.u32 %v4646_v13, %v3365_v14  ;;  %v4826_v14 = vld [vmem:[#allocation2 + $0x6b4] sm:$0xf0]  ;;  %v3813_v21 = vld [vmem:[#allocation2 + $0x488] sm:$0xf]  ;;  %v3638_v29 = vor.u32 %v4714_v19, %v3637_v18 }
 0x104   :  { %2140 = vmatpush.bf16.msrb.mxu0 %v3318_v36  ;;  %v4614_v36 = vld [vmem:[#allocation2 + $0x14] sm:$0xf0]  ;;  %v4245_v40 = vld [vmem:[#allocation2 + $0x7e8] sm:$0xf] }
 0x105   :  { %2131 = vmatpush.bf16.msra.mxu3 %v4146_v38  ;;  %v4117_v38 = vld [vmem:[#allocation2 + $0x6e8] sm:$0xf]  ;;  %v3238_v51 = vor.u32 %v4614_v36, %v3237_v33  ;;  %v4758_v56 = vld [vmem:[#allocation2 + $0x494] sm:$0xf0] }
 0x106   :  { %2155 = vmatpush.bf16.msra.mxu1 %v3414_v47  ;;  %v3861_v47 = vld [vmem:[#allocation2 + $0x4e8] sm:$0xf]  ;;  %v4118_v59 = vor.u32 %v4834_v49, %v4117_v38  ;;  %v4822_v28 = vld [vmem:[#allocation2 + $0x694] sm:$0xf0] }
 0x107   :  { %2166 = vmatpush.bf16.msra.mxu2 %v3574_v42  ;;  %v3685_v42 = vld [vmem:[#allocation2 + $0x388] sm:$0xf]  ;;  %v4782_v25 = vld [vmem:[#allocation2 + $0x554] sm:$0xf0] }
 0x108   :  { %2141 = vmatpush.bf16.msrb.mxu0 %v3302_v52  ;;  %v3686_v52 = vor.u32 %v4726_v43, %v3685_v42  ;;  %v4710_v35 = vld [vmem:[#allocation2 + $0x314] sm:$0xf0]  ;;  %v3797_v33 = vld [vmem:[#allocation2 + $0x468] sm:$0xf] }
 0x109   :  { %2132 = vmatpush.bf16.msra.mxu3 %v4130_v63  ;;  %v4101_v63 = vld [vmem:[#allocation2 + $0x6c8] sm:$0xf]  ;;  %v4866_v42 = vld [vmem:[#allocation2 + $0x7f4] sm:$0xf0] }
 0x10a   :  { %2156 = vmatpush.bf16.msra.mxu1 %v3398_v60  ;;  %v3845_v60 = vld [vmem:[#allocation2 + $0x4c8] sm:$0xf]  ;;  %v4102_v8 = vor.u32 %v4830_v0, %v4101_v63  ;;  %v4778_v38 = vld [vmem:[#allocation2 + $0x534] sm:$0xf0]  ;;  %v4672_v0 = vld [vmem:[#allocation2 + $0x1ec] sm:$0xf] }
 0x10b   :  { %2167 = vmatpush.bf16.msra.mxu2 %v3558_v55  ;;  %v3862_v55 = vor.u32 %v4770_v31, %v3861_v47  ;;  %v3846_v5 = vor.u32 %v4766_v61, %v3845_v60  ;;  %v4053_v44 = vld [vmem:[#allocation2 + $0x668] sm:$0xf]  ;;  %v4818_v47 = vld [vmem:[#allocation2 + $0x674] sm:$0xf0] }
 0x10c   :  { %2142 = vmatpush.bf16.msrb.mxu0 %v3286_v3  ;;  %2133 = vmatmul.bf16.vlgmr.msra.gmra.mxu3 %v5356_v37  ;;  %v3941_v3 = vld [vmem:[#allocation2 + $0x588] sm:$0xf]  ;;  %v4054_v53 = vor.u32 %v4818_v47, %v4053_v44  ;;  %v4750_v45 = vld [vmem:[#allocation2 + $0x454] sm:$0xf0]  ;;  %v3335_v44 = vld [vmem:[#allocation2 + $0xd8] sm:$0xf0] }
 0x10d   :  { %2177 = vmatpush.bf16.msrb.mxu3 %v3734_v4  ;;  %v4790_v4 = vld [vmem:[#allocation2 + $0x594] sm:$0xf0]  ;;  %v4037_v58 = vld [vmem:[#allocation2 + $0x648] sm:$0xf] }
 0x10e   :  { %2157 = vmatpush.bf16.msra.mxu1 %v3382_v10  ;;  %v4762_v10 = vld [vmem:[#allocation2 + $0x4b4] sm:$0xf0]  ;;  %v3942_v11 = vor.u32 %v4790_v4, %v3941_v3  ;;  %v3877_v60 = vld [vmem:[#allocation2 + $0x508] sm:$0xf] }
 0x10f   :  { %2168 = vmatpush.bf16.msra.mxu2 %v3542_v6  ;;  %v3653_v6 = vld [vmem:[#allocation2 + $0x348] sm:$0xf]  ;;  %v3830_v17 = vor.u32 %v4762_v10, %v3829_v9  ;;  %v4774_v61 = vld [vmem:[#allocation2 + $0x514] sm:$0xf0] }
 0x110   :  { %2143 = vmatpush.bf16.msrb.mxu0 %v3270_v15  ;;  %v3654_v13 = vor.u32 %v4718_v7, %v3653_v6  ;;  %v3925_v15 = vld [vmem:[#allocation2 + $0x568] sm:$0xf]  ;;  %v4858_v7 = vld [vmem:[#allocation2 + $0x7b4] sm:$0xf0] }
 0x111   :  { %2178 = vmatpush.bf16.msrb.mxu3 %v3718_v16  ;;  %v4786_v16 = vld [vmem:[#allocation2 + $0x574] sm:$0xf0]  ;;  %v3765_v3 = vld [vmem:[#allocation2 + $0x428] sm:$0xf] }
 0x112   :  { %2158 = vmatpush.bf16.msra.mxu1 %v3366_v24  ;;  %v3926_v22 = vor.u32 %v4786_v16, %v3925_v15  ;;  %v4069_v24 = vld [vmem:[#allocation2 + $0x688] sm:$0xf]  ;;  %v4810_v10 = vld [vmem:[#allocation2 + $0x634] sm:$0xf0]  ;;  %v3463_v15 = vld [vmem:[#allocation2 + $0x1d8] sm:$0xf0] }
 0x113   :  { %2169 = vmatpush.bf16.msra.mxu2 %v3526_v20  ;;  %v4086_v20 = vor.u32 %v4826_v14, %v4085_v12  ;;  %v4070_v36 = vor.u32 %v4822_v28, %v4069_v24  ;;  %v4213_v6 = vld [vmem:[#allocation2 + $0x7a8] sm:$0xf]  ;;  %v4668_v12 = vld [vmem:[#allocation2 + $0x1cc] sm:$0xf]  ;;  %v3351_v24 = vld [vmem:[#allocation2 + $0xf8] sm:$0xf0] }
 0x114   :  { %2144 = vmatpush.bf16.msrb.mxu0 %v3254_v32  ;;  %v3814_v32 = vor.u32 %v4758_v56, %v3813_v21  ;;  %v4021_v9 = vld [vmem:[#allocation2 + $0x628] sm:$0xf]  ;;  %v4854_v21 = vld [vmem:[#allocation2 + $0x794] sm:$0xf0]  ;;  %v3466_v28 = vor.u32 %v4668_v12, %v3463_v15 }
 0x115   :  { %2179 = vmatpush.bf16.msrb.mxu3 %v3702_v34  ;;  %2159 = vmatmul.bf16.vlgmr.msra.gmra.mxu1 %v5323_v1  ;;  %v3621_v34 = vld [vmem:[#allocation2 + $0x308] sm:$0xf]  ;;  %v4022_v18 = vor.u32 %v4810_v10, %v4021_v9  ;;  %v4806_v56 = vld [vmem:[#allocation2 + $0x614] sm:$0xf0]  ;;  %v4692_v9 = vld [vmem:[#allocation2 + $0x28c] sm:$0xf] }
 0x116   :  { %2203 = vmatpush.bf16.msrb.mxu1 %v3990_v30  ;;  %v3909_v30 = vld [vmem:[#allocation2 + $0x548] sm:$0xf]  ;;  %v3622_v31 = vor.u32 %v4710_v35, %v3621_v34  ;;  %v4664_v34 = vld [vmem:[#allocation2 + $0x1ac] sm:$0xf]  ;;  %v3447_v35 = vld [vmem:[#allocation2 + $0x1b8] sm:$0xf0] }
 0x117   :  { %2170 = vmatpush.bf16.msra.mxu2 %v3510_v39  ;;  %v4754_v39 = vld [vmem:[#allocation2 + $0x474] sm:$0xf0]  ;;  %v3910_v43 = vor.u32 %v4782_v25, %v3909_v30  ;;  %v3749_v16 = vld [vmem:[#allocation2 + $0x408] sm:$0xf]  ;;  %v3607_v30 = vld [vmem:[#allocation2 + $0x2f8] sm:$0xf0]  ;;  %v3450_v47 = vor.u32 %v4664_v34, %v3447_v35 }
 0x118   :  { %2145 = vmatpush.bf16.msrb.mxu0 %v3238_v51  ;;  %v3798_v49 = vor.u32 %v4754_v39, %v3797_v33  ;;  %v4246_v51 = vor.u32 %v4866_v42, %v4245_v40  ;;  %v4005_v19 = vld [vmem:[#allocation2 + $0x608] sm:$0xf]  ;;  %v4850_v40 = vld [vmem:[#allocation2 + $0x774] sm:$0xf0]  ;;  %v3559_v10 = vld [vmem:[#allocation2 + $0x298] sm:$0xf0] }
 0x119   :  { %2180 = vmatpush.bf16.msrb.mxu3 %v3686_v52  ;;  %v3781_v52 = vld [vmem:[#allocation2 + $0x448] sm:$0xf]  ;;  %v4006_v33 = vor.u32 %v4806_v56, %v4005_v19  ;;  %v3562_v19 = vor.u32 %v4692_v9, %v3559_v10  ;;  %v3735_v56 = vld [vmem:[#allocation2 + $0x3f8] sm:$0xf0]  ;;  %v4612_v9 = vld [vmem:[#allocation2 + $0xc] sm:$0xf] }
 0x11a   :  { %2204 = vmatpush.bf16.msrb.mxu1 %v3974_v48  ;;  %v3893_v48 = vld [vmem:[#allocation2 + $0x528] sm:$0xf]  ;;  %v3239_v10 = vld [vmem:[#allocation2 + $0x18] sm:$0xf0] }
 0x11b   :  { %2171 = vmatpush.bf16.msra.mxu2 %v3494_v54  ;;  %2146 = vmatmul.bf16.vlgmr.msrb.gmra.mxu0 %v5329_v23  ;;  %v4229_v54 = vld [vmem:[#allocation2 + $0x7c8] sm:$0xf]  ;;  %v3894_v57 = vor.u32 %v4778_v38, %v3893_v48  ;;  %v3591_v48 = vld [vmem:[#allocation2 + $0x2d8] sm:$0xf0] }
 0x11c   :  { %2190 = vmatpush.bf16.msra.mxu0 %v3862_v55  ;;  %v4862_v55 = vld [vmem:[#allocation2 + $0x7d4] sm:$0xf0]  ;;  %v4181_v39 = vld [vmem:[#allocation2 + $0x768] sm:$0xf] }
 0x11d   :  { %2181 = vmatpush.bf16.msrb.mxu3 %v3670_v2  ;;  %v4230_v63 = vor.u32 %v4862_v55, %v4229_v54  ;;  %v3479_v2 = vld [vmem:[#allocation2 + $0x1f8] sm:$0xf0]  ;;  %v4182_v38 = vor.u32 %v4850_v40, %v4181_v39  ;;  %v4632_v55 = vld [vmem:[#allocation2 + $0xac] sm:$0xf] }
 0x11e   :  { %2205 = vmatpush.bf16.msrb.mxu1 %v3958_v62  ;;  %2172 = vmatmul.bf16.vlgmr.msra.gmra.mxu2 %v5331_v26  ;;  %v3782_v62 = vor.u32 %v4750_v45, %v3781_v52  ;;  %v4846_v45 = vld [vmem:[#allocation2 + $0x754] sm:$0xf0]  ;;  %v3271_v39 = vld [vmem:[#allocation2 + $0x58] sm:$0xf0]  ;;  %v4732_v40 = vld [vmem:[#allocation2 + $0x3cc] sm:$0xf] }
 0x11f   :  { %2216 = vmatpush.bf16.msrb.mxu2 %v4118_v59  ;;  %v4814_v59 = vld [vmem:[#allocation2 + $0x654] sm:$0xf0] }
 0x120   :  { %2191 = vmatpush.bf16.msra.mxu0 %v3846_v5  ;;  %v4038_v4 = vor.u32 %v4814_v59, %v4037_v58  ;;  %v4746_v5 = vld [vmem:[#allocation2 + $0x434] sm:$0xf0] }
 0x121   :  { %2182 = vmatpush.bf16.msrb.mxu3 %v3654_v13  ;;  %v3766_v14 = vor.u32 %v4746_v5, %v3765_v3  ;;  %v4214_v13 = vor.u32 %v4858_v7, %v4213_v6  ;;  %v4149_v3 = vld [vmem:[#allocation2 + $0x728] sm:$0xf]  ;;  %v4628_v6 = vld [vmem:[#allocation2 + $0x8c] sm:$0xf]  ;;  %v3303_v7 = vld [vmem:[#allocation2 + $0x98] sm:$0xf0] }
 0x122   :  { %2206 = vmatpush.bf16.msrb.mxu1 %v3942_v11  ;;  %v3482_v11 = vor.u32 %v4672_v0, %v3479_v2  ;;  %v3415_v0 = vld [vmem:[#allocation2 + $0x178] sm:$0xf0]  ;;  %v3306_v15 = vor.u32 %v4628_v6, %v3303_v7 }
 0x123   :  { %2217 = vmatpush.bf16.msrb.mxu2 %v4102_v8  ;;  %v3878_v8 = vor.u32 %v4774_v61, %v3877_v60  ;;  %v4696_v60 = vld [vmem:[#allocation2 + $0x2ac] sm:$0xf]  ;;  %v3575_v61 = vld [vmem:[#allocation2 + $0x2b8] sm:$0xf0] }
 0x124   :  { %2192 = vmatpush.bf16.msra.mxu0 %v3830_v17  ;;  %v4742_v17 = vld [vmem:[#allocation2 + $0x414] sm:$0xf0]  ;;  %v3578_v5 = vor.u32 %v4696_v60, %v3575_v61  ;;  %v4728_v60 = vld [vmem:[#allocation2 + $0x3ac] sm:$0xf]  ;;  %v3703_v61 = vld [vmem:[#allocation2 + $0x3b8] sm:$0xf0] }
 0x125   :  { %2183 = vmatpush.bf16.msrb.mxu3 %v3638_v29  ;;  %v4704_v29 = vld [vmem:[#allocation2 + $0x2ec] sm:$0xf]  ;;  %v3750_v25 = vor.u32 %v4742_v17, %v3749_v16  ;;  %v4133_v16 = vld [vmem:[#allocation2 + $0x708] sm:$0xf]  ;;  %v4838_v17 = vld [vmem:[#allocation2 + $0x714] sm:$0xf0]  ;;  %v3706_v7 = vor.u32 %v4728_v60, %v3703_v61 }
 0x126   :  { %2207 = vmatpush.bf16.msrb.mxu1 %v3926_v22  ;;  %v4640_v22 = vld [vmem:[#allocation2 + $0xec] sm:$0xf]  ;;  %v3610_v42 = vor.u32 %v4704_v29, %v3607_v30  ;;  %v3543_v29 = vld [vmem:[#allocation2 + $0x278] sm:$0xf0]  ;;  %v4134_v30 = vor.u32 %v4838_v17, %v4133_v16 }
 0x127   :  { %2218 = vmatpush.bf16.msrb.mxu2 %v4086_v20  ;;  %v4197_v20 = vld [vmem:[#allocation2 + $0x788] sm:$0xf]  ;;  %v3495_v17 = vld [vmem:[#allocation2 + $0x218] sm:$0xf0]  ;;  %v4824_v61 = vld [vmem:[#allocation2 + $0x6ac] sm:$0xf] }
 0x128   :  { %2193 = vmatpush.bf16.msra.mxu0 %v3814_v32  ;;  %v4198_v32 = vor.u32 %v4854_v21, %v4197_v20  ;;  %v3287_v20 = vld [vmem:[#allocation2 + $0x78] sm:$0xf0]  ;;  %v4736_v21 = vld [vmem:[#allocation2 + $0x3ec] sm:$0xf] }
 0x129   :  { %2184 = vmatpush.bf16.msrb.mxu3 %v3622_v31  ;;  %v4700_v31 = vld [vmem:[#allocation2 + $0x2cc] sm:$0xf]  ;;  %v3738_v35 = vor.u32 %v4736_v21, %v3735_v56  ;;  %v4119_v56 = vld [vmem:[#allocation2 + $0x6f8] sm:$0xf0] }
 0x12a   :  { %2208 = vmatpush.bf16.msrb.mxu1 %v3910_v43  ;;  %v4636_v43 = vld [vmem:[#allocation2 + $0xcc] sm:$0xf]  ;;  %v3594_v54 = vor.u32 %v4700_v31, %v3591_v48  ;;  %v3527_v31 = vld [vmem:[#allocation2 + $0x258] sm:$0xf0]  ;;  %v5382_v48 = vld [vmem:[%s5523_s4] sm:$0xf] }
 0x12b   :  { %2219 = vmatpush.bf16.msrb.mxu2 %v4070_v36  ;;  %v3354_v36 = vor.u32 %v4640_v22, %v3351_v24  ;;  %v3338_v52 = vor.u32 %v4636_v43, %v3335_v44  ;;  %v4832_v21 = vld [vmem:[#allocation2 + $0x6ec] sm:$0xf] }
 0x12c   :  { %2194 = vmatpush.bf16.msra.mxu0 %v3798_v49  ;;  %2185 = vmatmul.bf16.vlgmr.msrb.gmra.mxu3 %v5346_v50  ;;  %v4660_v49 = vld [vmem:[#allocation2 + $0x18c] sm:$0xf] }
 0x12d   :  { %2229 = vmatpush.bf16.msra.mxu3 %v4246_v51  ;;  %v3431_v51 = vld [vmem:[#allocation2 + $0x198] sm:$0xf0] }
 0x12e   :  { %2209 = vmatpush.bf16.msrb.mxu1 %v3894_v57  ;;  %v3319_v57 = vld [vmem:[#allocation2 + $0xb8] sm:$0xf0]  ;;  %v3434_v59 = vor.u32 %v4660_v49, %v3431_v51  ;;  %v4644_v49 = vld [vmem:[#allocation2 + $0x10c] sm:$0xf] }
 0x12f   :  { %2220 = vmatpush.bf16.msrb.mxu2 %v4054_v53  ;;  %v4165_v53 = vld [vmem:[#allocation2 + $0x748] sm:$0xf]  ;;  %v3322_v2 = vor.u32 %v4632_v55, %v3319_v57  ;;  %v3367_v51 = vld [vmem:[#allocation2 + $0x118] sm:$0xf0]  ;;  %v4616_v55 = vld [vmem:[#allocation2 + $0x2c] sm:$0xf] }
 0x130   :  { %2195 = vmatpush.bf16.msra.mxu0 %v3782_v62  ;;  %v4166_v62 = vor.u32 %v4846_v45, %v4165_v53  ;;  %v4800_v45 = vld [vmem:[#allocation2 + $0x5ec] sm:$0xf] }
 0x131   :  { %2230 = vmatpush.bf16.msra.mxu3 %v4230_v63  ;;  %v4656_v63 = vld [vmem:[#allocation2 + $0x16c] sm:$0xf] }
 0x132   :  { %2210 = vmatpush.bf16.msrb.mxu1 %v3878_v8  ;;  %v5372_v58 = vpop.f32.mrf.mxu1  ;;  %v3418_v8 = vor.u32 %v4656_v63, %v3415_v0  ;;  %v3370_v63 = vor.u32 %v4644_v49, %v3367_v51  ;;  %v4680_v0 = vld [vmem:[#allocation2 + $0x22c] sm:$0xf]  ;;  %v3943_v51 = vld [vmem:[#allocation2 + $0x598] sm:$0xf0] }
 0x133   :  { %2221 = vmatpush.bf16.msrb.mxu2 %v4038_v4  ;;  %v4842_v4 = vld [vmem:[#allocation2 + $0x734] sm:$0xf0]  ;;  %v4788_v49 = vld [vmem:[#allocation2 + $0x58c] sm:$0xf] }
 0x134   :  { %2196 = vmatpush.bf16.msra.mxu0 %v3766_v14  ;;  %v4150_v12 = vor.u32 %v4842_v4, %v4149_v3  ;;  %v4652_v14 = vld [vmem:[#allocation2 + $0x14c] sm:$0xf]  ;;  %v642_v3 = vperm.slane %v5382_v48, 0 }
 0x135   :  { %2231 = vmatpush.bf16.msra.mxu3 %v4214_v13  ;;  %2211 = vmatmul.bf16.vlgmr.msrb.gmra.mxu1 %v5339_v27  ;;  %v3399_v13 = vld [vmem:[#allocation2 + $0x158] sm:$0xf0] }
 0x136   :  { %2255 = vmatpush.bf16.msra.mxu1 %v3482_v11  ;;  %v3402_v24 = vor.u32 %v4652_v14, %v3399_v13  ;;  %v4676_v14 = vld [vmem:[#allocation2 + $0x20c] sm:$0xf] }
 0x137   :  { %2222 = vmatpush.bf16.msrb.mxu2 %v4022_v18  ;;  %v4624_v18 = vld [vmem:[#allocation2 + $0x6c] sm:$0xf] }
 0x138   :  { %2197 = vmatpush.bf16.msra.mxu0 %v3750_v25  ;;  %v5375_v11 = vpop.f32.mrf.mxu0  ;;  %v4648_v25 = vld [vmem:[#allocation2 + $0x12c] sm:$0xf]  ;;  %v3290_v34 = vor.u32 %v4624_v18, %v3287_v20 }
 0x139   :  { %2232 = vmatpush.bf16.msra.mxu3 %v4198_v32  ;;  %v3383_v32 = vld [vmem:[#allocation2 + $0x138] sm:$0xf0]  ;;  %v4724_v13 = vld [vmem:[#allocation2 + $0x38c] sm:$0xf] }
 0x13a   :  { %2256 = vmatpush.bf16.msra.mxu1 %v3466_v28  ;;  %v1954_v22 = vpop.f32.mrf.mxu1  ;;  %v4688_v28 = vld [vmem:[#allocation2 + $0x26c] sm:$0xf]  ;;  %v3386_v44 = vor.u32 %v4648_v25, %v3383_v32  ;;  %v3959_v25 = vld [vmem:[#allocation2 + $0x5b8] sm:$0xf0]  ;;  %v3498_v32 = vor.u32 %v4676_v14, %v3495_v17 }
 0x13b   :  { %2223 = vmatpush.bf16.msrb.mxu2 %v4006_v33  ;;  %2198 = vmatmul.bf16.vlgmr.msra.gmra.mxu0 %v5344_v46  ;;  %v4620_v33 = vld [vmem:[#allocation2 + $0x4c] sm:$0xf]  ;;  %v1940_v22 = vadd.f32 %v5375_v11, %v642_v3  ;;  %v3911_v17 = vld [vmem:[#allocation2 + $0x558] sm:$0xf0] }
 0x13c   :  { %2242 = vmatpush.bf16.msrb.mxu0 %v3354_v36  ;;  %v3546_v36 = vor.u32 %v4688_v28, %v3543_v29  ;;  %v4768_v18 = vld [vmem:[#allocation2 + $0x4ec] sm:$0xf]  ;;  %v3242_v28 = vor.u32 %v4612_v9, %v3239_v10  ;;  %v3815_v10 = vld [vmem:[#allocation2 + $0x498] sm:$0xf0] }
 0x13d   :  { %2233 = vmatpush.bf16.msra.mxu3 %v4182_v38  ;;  %v4756_v9 = vld [vmem:[#allocation2 + $0x48c] sm:$0xf] }
 0x13e   :  { %2257 = vmatpush.bf16.msra.mxu1 %v3450_v47  ;;  %2224 = vmatmul.bf16.vlgmr.msrb.gmra.mxu2 %v5349_v41  ;;  %v4684_v47 = vld [vmem:[#allocation2 + $0x24c] sm:$0xf] }
 0x13f   :  { %2268 = vmatpush.bf16.msra.mxu2 %v3610_v42  ;;  %v3719_v42 = vld [vmem:[#allocation2 + $0x3d8] sm:$0xf0]  ;;  %v3530_v57 = vor.u32 %v4684_v47, %v3527_v31  ;;  %v1953_v31 = vadd.f32 %v5372_v58, %v1940_v22  ;;  %v3946_v58 = vor.u32 %v4788_v49, %v3943_v51  ;;  %v4820_v14 = vld [vmem:[#allocation2 + $0x68c] sm:$0xf] }
 0x140   :  { %2243 = vmatpush.bf16.msrb.mxu0 %v3338_v52  ;;  %v1941_v38 = vpop.f32.mrf.mxu0  ;;  %v3274_v52 = vor.u32 %v4620_v33, %v3271_v39  ;;  %v3722_v53 = vor.u32 %v4732_v40, %v3719_v42  ;;  %v3671_v33 = vld [vmem:[#allocation2 + $0x378] sm:$0xf0]  ;;  %v4122_v39 = vor.u32 %v4832_v21, %v4119_v56  ;;  %v4764_v40 = vld [vmem:[#allocation2 + $0x4cc] sm:$0xf] }
 0x141   :  { %2234 = vmatpush.bf16.msra.mxu3 %v4166_v62  ;;  %v5377_v43 = vpop.f32.mrf.mxu2  ;;  %v3847_v42 = vld [vmem:[#allocation2 + $0x4d8] sm:$0xf0]  ;;  %v4752_v56 = vld [vmem:[#allocation2 + $0x46c] sm:$0xf] }
 0x142   :  { %2258 = vmatpush.bf16.msra.mxu1 %v3434_v59  ;;  %v3255_v59 = vld [vmem:[#allocation2 + $0x38] sm:$0xf0]  ;;  %v5385_v62 = vpop.f32.mrf.mxu1  ;;  %v4860_v49 = vld [vmem:[#allocation2 + $0x7cc] sm:$0xf] }
 0x143   :  { %2269 = vmatpush.bf16.msra.mxu2 %v3594_v54  ;;  %v3991_v54 = vld [vmem:[#allocation2 + $0x5f8] sm:$0xf0]  ;;  %v3258_v6 = vor.u32 %v4616_v55, %v3255_v59 }
 0x144   :  { %2244 = vmatpush.bf16.msrb.mxu0 %v3322_v2  ;;  %v3511_v2 = vld [vmem:[#allocation2 + $0x238] sm:$0xf0]  ;;  %v3994_v4 = vor.u32 %v4800_v45, %v3991_v54  ;;  %v1966_v54 = vadd.f32 %v5377_v43, %v1953_v31 }
 0x145   :  { %2235 = vmatpush.bf16.msra.mxu3 %v4150_v12  ;;  %v3514_v12 = vor.u32 %v4680_v0, %v3511_v2  ;;  %v4103_v47 = vld [vmem:[#allocation2 + $0x6d8] sm:$0xf0] }
 0x146   :  { %2259 = vmatpush.bf16.msra.mxu1 %v3418_v8  ;;  %v3975_v8 = vld [vmem:[#allocation2 + $0x5d8] sm:$0xf0] }
 0x147   :  { %2270 = vmatpush.bf16.msra.mxu2 %v3578_v5  ;;  %v4796_v5 = vld [vmem:[#allocation2 + $0x5cc] sm:$0xf]  ;;  %v3655_v45 = vld [vmem:[#allocation2 + $0x358] sm:$0xf0] }
 0x148   :  { %2245 = vmatpush.bf16.msrb.mxu0 %v3306_v15  ;;  %v3687_v15 = vld [vmem:[#allocation2 + $0x398] sm:$0xf0]  ;;  %v3978_v20 = vor.u32 %v4796_v5, %v3975_v8 }
 0x149   :  { %2236 = vmatpush.bf16.msra.mxu3 %v4134_v30  ;;  %v1967_v16 = vpop.f32.mrf.mxu2  ;;  %v3690_v29 = vor.u32 %v4724_v13, %v3687_v15  ;;  %v4792_v30 = vld [vmem:[#allocation2 + $0x5ac] sm:$0xf]  ;;  %v3831_v59 = vld [vmem:[#allocation2 + $0x4b8] sm:$0xf0] }
 0x14a   :  { %2260 = vmatpush.bf16.msra.mxu1 %v3402_v24  ;;  %v1991_v24 = vpop.f32.mrf.mxu0  ;;  %v3962_v11 = vor.u32 %v4792_v30, %v3959_v25  ;;  %v3927_v43 = vld [vmem:[#allocation2 + $0x578] sm:$0xf0]  ;;  %v4780_v16 = vld [vmem:[#allocation2 + $0x54c] sm:$0xf] }
 0x14b   :  { %2271 = vmatpush.bf16.msra.mxu2 %v3562_v19  ;;  %v3863_v19 = vld [vmem:[#allocation2 + $0x4f8] sm:$0xf0] }
 0x14c   :  { %2246 = vmatpush.bf16.msrb.mxu0 %v3290_v34  ;;  %2237 = vmatmul.bf16.vlgmr.msra.gmra.mxu3 %v5356_v37  ;;  %v3866_v34 = vor.u32 %v4768_v18, %v3863_v19  ;;  %v4071_v13 = vld [vmem:[#allocation2 + $0x698] sm:$0xf0]  ;;  %v3818_v19 = vor.u32 %v4756_v9, %v3815_v10  ;;  %v4740_v10 = vld [vmem:[#allocation2 + $0x40c] sm:$0xf] }
 0x14d   :  { %2281 = vmatpush.bf16.msrb.mxu3 %v3738_v35  ;;  %v4720_v35 = vld [vmem:[#allocation2 + $0x36c] sm:$0xf]  ;;  %v3623_v21 = vld [vmem:[#allocation2 + $0x318] sm:$0xf0]  ;;  %v4074_v22 = vor.u32 %v4820_v14, %v4071_v13 }
 0x14e   :  { %2261 = vmatpush.bf16.msra.mxu1 %v3386_v44  ;;  %v4828_v44 = vld [vmem:[#allocation2 + $0x6cc] sm:$0xf]  ;;  %v3674_v38 = vor.u32 %v4720_v35, %v3671_v33  ;;  %v4247_v30 = vld [vmem:[#allocation2 + $0x7f8] sm:$0xf0] }
 0x14f   :  { %2272 = vmatpush.bf16.msra.mxu2 %v3546_v36  ;;  %v2006_v36 = vpop.f32.mrf.mxu1  ;;  %v4106_v55 = vor.u32 %v4828_v44, %v4103_v47  ;;  %v4748_v44 = vld [vmem:[#allocation2 + $0x44c] sm:$0xf]  ;;  %v4231_v51 = vld [vmem:[#allocation2 + $0x7d8] sm:$0xf0] }
 0x150   :  { %2247 = vmatpush.bf16.msrb.mxu0 %v3274_v52  ;;  %v3850_v52 = vor.u32 %v4764_v40, %v3847_v42  ;;  %v3895_v40 = vld [vmem:[#allocation2 + $0x538] sm:$0xf0] }
 0x151   :  { %2282 = vmatpush.bf16.msrb.mxu3 %v3722_v53  ;;  %v4716_v53 = vld [vmem:[#allocation2 + $0x34c] sm:$0xf]  ;;  %v5392_v60 = vpop.f32.mrf.mxu2 }
 0x152   :  { %2262 = vmatpush.bf16.msra.mxu1 %v3370_v63  ;;  %v4087_v63 = vld [vmem:[#allocation2 + $0x6b8] sm:$0xf0]  ;;  %v1993_v2 = vpop.f32.mrf.mxu0  ;;  %v3658_v3 = vor.u32 %v4716_v53, %v3655_v45  ;;  %v4772_v45 = vld [vmem:[#allocation2 + $0x50c] sm:$0xf] }
 0x153   :  { %2273 = vmatpush.bf16.msra.mxu2 %v3530_v57  ;;  %v4760_v57 = vld [vmem:[#allocation2 + $0x4ac] sm:$0xf] }
 0x154   :  { %2248 = vmatpush.bf16.msrb.mxu0 %v3258_v6  ;;  %v3834_v5 = vor.u32 %v4760_v57, %v3831_v59  ;;  %v4712_v6 = vld [vmem:[#allocation2 + $0x32c] sm:$0xf]  ;;  %v4234_v59 = vor.u32 %v4860_v49, %v4231_v51  ;;  %v4167_v51 = vld [vmem:[#allocation2 + $0x758] sm:$0xf0] }
 0x155   :  { %2283 = vmatpush.bf16.msrb.mxu3 %v3706_v7  ;;  %2263 = vmatmul.bf16.vlgmr.msra.gmra.mxu1 %v5323_v1  ;;  %v1978_v1 = vpop.f32.mrf.mxu3  ;;  %v3639_v7 = vld [vmem:[#allocation2 + $0x338] sm:$0xf0] }
 0x156   :  { %2307 = vmatpush.bf16.msrb.mxu1 %v3994_v4  ;;  %v1979_v0 = vadd.f32 %v1978_v1, %v1966_v54  ;;  %v4784_v4 = vld [vmem:[#allocation2 + $0x56c] sm:$0xf]  ;;  %v3642_v15 = vor.u32 %v4712_v6, %v3639_v7  ;;  %v3879_v54 = vld [vmem:[#allocation2 + $0x518] sm:$0xf0] }
 0x157   :  { %2274 = vmatpush.bf16.msra.mxu2 %v3514_v12  ;;  %v5396_v8 = vpop.f32.mrf.mxu1  ;;  %v3930_v12 = vor.u32 %v4784_v4, %v3927_v43  ;;  %v4377_v4 = vld [vmem:[#allocation5 + $0xf0] sm:$0xf]  ;;  %v4898_v43 = vld [vmem:[#allocation5 + $0xf4] sm:$0xf0]  ;;  %v4808_v6 = vld [vmem:[#allocation2 + $0x62c] sm:$0xf] }
 0x158   :  { %2249 = vmatpush.bf16.msrb.mxu0 %v3242_v28  ;;  %v3799_v28 = vld [vmem:[#allocation2 + $0x478] sm:$0xf0]  ;;  %v4378_v14 = vor.u32 %v4898_v43, %v4377_v4  ;;  %v4289_v4 = vld [vmem:[#allocation5 + $0x40] sm:$0xf]  ;;  %v4876_v43 = vld [vmem:[#allocation5 + $0x44] sm:$0xf0] }
 0x159   :  { %2284 = vmatpush.bf16.msrb.mxu3 %v3690_v29  ;;  %v4864_v29 = vld [vmem:[#allocation2 + $0x7ec] sm:$0xf]  ;;  %v2019_v25 = vpop.f32.mrf.mxu2  ;;  %v3802_v42 = vor.u32 %v4752_v56, %v3799_v28  ;;  %v4023_v7 = vld [vmem:[#allocation2 + $0x638] sm:$0xf0]  ;;  %v4313_v56 = vld [vmem:[#allocation5 + $0x70] sm:$0xf] }
 0x15a   :  { %2308 = vmatpush.bf16.msrb.mxu1 %v3978_v20  ;;  %v4708_v20 = vld [vmem:[#allocation2 + $0x30c] sm:$0xf]  ;;  %v5399_v33 = vpop.f32.mrf.mxu0 }
 0x15b   :  { %2275 = vmatpush.bf16.msra.mxu2 %v3498_v32  ;;  %2250 = vmatmul.bf16.vlgmr.msrb.gmra.mxu0 %v5329_v23  ;;  %v4090_v23 = vor.u32 %v4824_v61, %v4087_v63  ;;  %v3914_v32 = vor.u32 %v4780_v16, %v3911_v17  ;;  %v3626_v36 = vor.u32 %v4708_v20, %v3623_v21  ;;  %v3767_v61 = vld [vmem:[#allocation2 + $0x438] sm:$0xf0]  ;;  %v4856_v63 = vld [vmem:[#allocation2 + $0x7ac] sm:$0xf]  ;;  %v4896_v20 = vld [vmem:[#allocation5 + $0xe4] sm:$0xf0] }
 0x15c   :  { %2294 = vmatpush.bf16.msra.mxu0 %v3866_v34  ;;  %v4816_v34 = vld [vmem:[#allocation2 + $0x66c] sm:$0xf]  ;;  %v4199_v17 = vld [vmem:[#allocation2 + $0x798] sm:$0xf0] }
 0x15d   :  { %2285 = vmatpush.bf16.msrb.mxu3 %v3674_v38  ;;  %v1980_v18 = vpop.f32.mrf.mxu3  ;;  %v3783_v38 = vld [vmem:[#allocation2 + $0x458] sm:$0xf0]  ;;  %v4852_v16 = vld [vmem:[#allocation2 + $0x78c] sm:$0xf] }
 0x15e   :  { %2309 = vmatpush.bf16.msrb.mxu1 %v3962_v11  ;;  %2276 = vmatmul.bf16.vlgmr.msra.gmra.mxu2 %v5331_v26  ;;  %v1992_v26 = vadd.f32 %v1991_v24, %v1979_v0  ;;  %v4055_v24 = vld [vmem:[#allocation2 + $0x678] sm:$0xf0]  ;;  %v4250_v11 = vor.u32 %v4864_v29, %v4247_v30  ;;  %v3786_v57 = vor.u32 %v4748_v44, %v3783_v38 }
 0x15f   :  { %2320 = vmatpush.bf16.msrb.mxu2 %v4122_v39  ;;  %v4776_v39 = vld [vmem:[#allocation2 + $0x52c] sm:$0xf]  ;;  %v2058_v47 = vpop.f32.mrf.mxu1  ;;  %v4058_v31 = vor.u32 %v4816_v34, %v4055_v24  ;;  %v4007_v21 = vld [vmem:[#allocation2 + $0x618] sm:$0xf0]  ;;  %v4202_v25 = vor.u32 %v4852_v16, %v4199_v17  ;;  %v643_v16 = vperm.slane %v5382_v48, 1 }
 0x160   :  { %2295 = vmatpush.bf16.msra.mxu0 %v3850_v52  ;;  %v2005_v35 = vadd.f32 %v5385_v62, %v1992_v26  ;;  %v3898_v1 = vor.u32 %v4776_v39, %v3895_v40  ;;  %v4812_v52 = vld [vmem:[#allocation2 + $0x64c] sm:$0xf]  ;;  %v4039_v62 = vld [vmem:[#allocation2 + $0x658] sm:$0xf0]  ;;  %v4894_v39 = vld [vmem:[#allocation5 + $0xd4] sm:$0xf0] }
 0x161   :  { %2286 = vmatpush.bf16.msrb.mxu3 %v3658_v3  ;;  %v4042_v2 = vor.u32 %v4812_v52, %v4039_v62  ;;  %v4215_v3 = vld [vmem:[#allocation2 + $0x7b8] sm:$0xf0]  ;;  %v4297_v62 = vld [vmem:[#allocation5 + $0x50] sm:$0xf] }
 0x162   :  { %2310 = vmatpush.bf16.msrb.mxu1 %v3946_v58  ;;  %v2018_v53 = vadd.f32 %v5392_v60, %v2005_v35  ;;  %v4744_v58 = vld [vmem:[#allocation2 + $0x42c] sm:$0xf]  ;;  %v3882_v60 = vor.u32 %v4772_v45, %v3879_v54  ;;  %v2045_v9 = vpop.f32.mrf.mxu0  ;;  %v4218_v26 = vor.u32 %v4856_v63, %v4215_v3  ;;  %v4183_v35 = vld [vmem:[#allocation2 + $0x778] sm:$0xf0]  ;;  %v4345_v63 = vld [vmem:[#allocation5 + $0xb0] sm:$0xf] }
 0x163   :  { %2321 = vmatpush.bf16.msrb.mxu2 %v4106_v55  ;;  %v3770_v13 = vor.u32 %v4744_v58, %v3767_v61  ;;  %v4151_v61 = vld [vmem:[#allocation2 + $0x738] sm:$0xf0]  ;;  %v4337_v9 = vld [vmem:[#allocation5 + $0xa0] sm:$0xf] }
 0x164   :  { %2296 = vmatpush.bf16.msra.mxu0 %v3834_v5  ;;  %v5404_v5 = vpop.f32.mrf.mxu2 }
 0x165   :  { %2287 = vmatpush.bf16.msrb.mxu3 %v3642_v15  ;;  %v2030_v55 = vpop.f32.mrf.mxu3  ;;  %v4804_v15 = vld [vmem:[#allocation2 + $0x60c] sm:$0xf] }
 0x166   :  { %2311 = vmatpush.bf16.msrb.mxu1 %v3930_v12  ;;  %v5402_v0 = vadd.f32 %v2030_v55, %v2018_v53  ;;  %v3751_v12 = vld [vmem:[#allocation2 + $0x418] sm:$0xf0]  ;;  %v4010_v34 = vor.u32 %v4804_v15, %v4007_v21  ;;  %v4878_v53 = vld [vmem:[#allocation5 + $0x54] sm:$0xf0]  ;;  %v4840_v55 = vld [vmem:[#allocation2 + $0x72c] sm:$0xf] }
 0x167   :  { %2322 = vmatpush.bf16.msrb.mxu2 %v4090_v23  ;;  %v3754_v30 = vor.u32 %v4740_v10, %v3751_v12  ;;  %v4298_v58 = vor.u32 %v4878_v53, %v4297_v62  ;;  %v4888_v10 = vld [vmem:[#allocation5 + $0xa4] sm:$0xf0]  ;;  %v4281_v12 = vld [vmem:[#allocation5 + $0x30] sm:$0xf]  ;;  %v4273_v21 = vld [vmem:[#allocation5 + $0x20] sm:$0xf] }
 0x168   :  { %2297 = vmatpush.bf16.msra.mxu0 %v3818_v19  ;;  %v2346_v23 = vmin.f32 %v5402_v0, 20.0  ;;  %v4369_v19 = vld [vmem:[#allocation5 + $0xe0] sm:$0xf]  ;;  %v4315_v62 = vld [vmem:[#allocation5 + $0x78] sm:$0xf0] }
 0x169   :  { %2288 = vmatpush.bf16.msrb.mxu3 %v3626_v36  ;;  %v4370_v28 = vor.u32 %v4896_v20, %v4369_v19  ;;  %v4361_v36 = vld [vmem:[#allocation5 + $0xd0] sm:$0xf]  ;;  %v4886_v19 = vld [vmem:[#allocation5 + $0x94] sm:$0xf0] }
 0x16a   :  { %2312 = vmatpush.bf16.msrb.mxu1 %v3914_v32  ;;  %v2350_v18 = vmul.f32 1.442695, %v2346_v23  ;;  %v4848_v32 = vld [vmem:[#allocation2 + $0x76c] sm:$0xf]  ;;  %v4362_v44 = vor.u32 %v4894_v39, %v4361_v36  ;;  %v4290_v23 = vor.u32 %v4876_v43, %v4289_v4 }
 0x16b   :  { %2323 = vmatpush.bf16.msrb.mxu2 %v4074_v22  ;;  %v4882_v22 = vld [vmem:[#allocation5 + $0x74] sm:$0xf0]  ;;  %v4186_v47 = vor.u32 %v4848_v32, %v4183_v35  ;;  %v4884_v32 = vld [vmem:[#allocation5 + $0x84] sm:$0xf0]  ;;  %v4379_v35 = vld [vmem:[#allocation5 + $0xf8] sm:$0xf0] }
 0x16c   :  { %2298 = vmatpush.bf16.msra.mxu0 %v3802_v42  ;;  %2289 = vmatmul.bf16.vlgmr.msrb.gmra.mxu3 %v5346_v50  ;;  %v4026_v50 = vor.u32 %v4808_v6, %v4023_v7  ;;  %4992 = vpow2.f32 %v2350_v18  ;;  %v4314_v24 = vor.u32 %v4882_v22, %v4313_v56  ;;  %v2071_v40 = vpop.f32.mrf.mxu2  ;;  %v4305_v42 = vld [vmem:[#allocation5 + $0x60] sm:$0xf]  ;;  %v4135_v6 = vld [vmem:[#allocation2 + $0x718] sm:$0xf0]  ;;  %v4872_v56 = vld [vmem:[#allocation5 + $0x24] sm:$0xf0] }
 0x16d   :  { %2333 = vmatpush.bf16.msra.mxu3 %v4250_v11  ;;  %v2032_v29 = vpop.f32.mrf.mxu3  ;;  %v4880_v11 = vld [vmem:[#allocation5 + $0x64] sm:$0xf0] }
 0x16e   :  { %2313 = vmatpush.bf16.msrb.mxu1 %v3898_v1  ;;  %v4306_v49 = vor.u32 %v4880_v11, %v4305_v42  ;;  %v4892_v1 = vld [vmem:[#allocation5 + $0xc4] sm:$0xf0]  ;;  %v4274_v29 = vor.u32 %v4872_v56, %v4273_v21  ;;  %v4283_v21 = vld [vmem:[#allocation5 + $0x38] sm:$0xf0] }
 0x16f   :  { %2324 = vmatpush.bf16.msrb.mxu2 %v4058_v31  ;;  %v4844_v31 = vld [vmem:[#allocation2 + $0x74c] sm:$0xf] }
 0x170   :  { %2299 = vmatpush.bf16.msra.mxu0 %v3786_v57  ;;  %v4170_v54 = vor.u32 %v4844_v31, %v4167_v51  ;;  %v4257_v31 = vld [vmem:[#allocation5] sm:$0xf]  ;;  %v4895_v51 = vld [vmem:[#allocation5 + $0xe4] sm:$0xf] }
 0x171   :  { %2334 = vmatpush.bf16.msra.mxu3 %v4234_v59 }
 0x172   :  { %2314 = vmatpush.bf16.msrb.mxu1 %v3882_v60  ;;  %v4993_v38 = vpop.eup %4992  ;;  %v5413_v3 = vpop.f32.mrf.mxu1  ;;  %v4154_v60 = vor.u32 %v4840_v55, %v4151_v61  ;;  %v4893_v55 = vld [vmem:[#allocation5 + $0xd4] sm:$0xf] }
 0x173   :  { %2325 = vmatpush.bf16.msrb.mxu2 %v4042_v2  ;;  %v2358_v52 = vadd.f32 1.0, %v4993_v38  ;;  %v4890_v2 = vld [vmem:[#allocation5 + $0xb4] sm:$0xf0] }
 0x174   :  { %2300 = vmatpush.bf16.msra.mxu0 %v3770_v13  ;;  %v4338_v13 = vor.u32 %v4888_v10, %v4337_v9  ;;  %v4889_v10 = vld [vmem:[#allocation5 + $0xb4] sm:$0xf] }
 0x175   :  { %2335 = vmatpush.bf16.msra.mxu3 %v4218_v26  ;;  %2315 = vmatmul.bf16.vlgmr.msrb.gmra.mxu1 %v5339_v27  ;;  %v4353_v27 = vld [vmem:[#allocation5 + $0xc0] sm:$0xf]  ;;  %v2362_v57 = vmul.f32 %v2358_v52, %v2358_v52  ;;  %v5411_v59 = vpop.f32.mrf.mxu3  ;;  %v4881_v52 = vld [vmem:[#allocation5 + $0x74] sm:$0xf] }
 0x176   :  { %2793 = vmatpush.bf16.msra.mxu1 %v4378_v14  ;;  %v4354_v45 = vor.u32 %v4892_v1, %v4353_v27  ;;  %v4874_v14 = vld [vmem:[#allocation5 + $0x34] sm:$0xf0]  ;;  %v4371_v27 = vld [vmem:[#allocation5 + $0xe8] sm:$0xf0] }
 0x177   :  { %2326 = vmatpush.bf16.msrb.mxu2 %v4026_v50  ;;  %v2370_v7 = vadd.f32 1.0, %v2362_v57  ;;  %v4282_v18 = vor.u32 %v4874_v14, %v4281_v12  ;;  %v4329_v50 = vld [vmem:[#allocation5 + $0x90] sm:$0xf]  ;;  %v4251_v42 = vadd.f32 -1.0, %v2362_v57  ;;  %v4363_v57 = vld [vmem:[#allocation5 + $0xd8] sm:$0xf0] }
 0x178   :  { %2301 = vmatpush.bf16.msra.mxu0 %v3754_v30  ;;  %v2095_v26 = vpop.f32.mrf.mxu0  ;;  %v4330_v22 = vor.u32 %v4886_v19, %v4329_v50  ;;  %v4265_v30 = vld [vmem:[#allocation5 + $0x10] sm:$0xf]  ;;  %v4347_v12 = vld [vmem:[#allocation5 + $0xb8] sm:$0xf0]  ;;  %v4339_v50 = vld [vmem:[#allocation5 + $0xa8] sm:$0xf0] }
 0x179   :  { %2336 = vmatpush.bf16.msra.mxu3 %v4202_v25  ;;  %4994 = vrcp.f32 %v2370_v7  ;;  %v4321_v25 = vld [vmem:[#allocation5 + $0x80] sm:$0xf] }
 0x17a   :  { %2794 = vmatpush.bf16.msra.mxu1 %v4370_v28  ;;  %v2110_v20 = vpop.f32.mrf.mxu1  ;;  %v2044_v28 = vadd.f32 %v5399_v33, %v643_v16  ;;  %v4322_v40 = vor.u32 %v4884_v32, %v4321_v25  ;;  %v4331_v25 = vld [vmem:[#allocation5 + $0x98] sm:$0xf0] }
 0x17b   :  { %2327 = vmatpush.bf16.msrb.mxu2 %v4010_v34  ;;  %2302 = vmatmul.bf16.vlgmr.msra.gmra.mxu0 %v5344_v46  ;;  %v4346_v46 = vor.u32 %v4890_v2, %v4345_v63  ;;  %v4870_v34 = vld [vmem:[#allocation5 + $0x14] sm:$0xf0]  ;;  %v4879_v63 = vld [vmem:[#allocation5 + $0x64] sm:$0xf]  ;;  %v4307_v2 = vld [vmem:[#allocation5 + $0x68] sm:$0xf0] }
 0x17c   :  { %2780 = vmatpush.bf16.msrb.mxu0 %v4314_v24  ;;  %v4897_v24 = vld [vmem:[#allocation5 + $0xf4] sm:$0xf]  ;;  %v4266_v33 = vor.u32 %v4870_v34, %v4265_v30  ;;  %v4310_v43 = vor.u32 %v4879_v63, %v4307_v2  ;;  %v4871_v34 = vld [vmem:[#allocation5 + $0x24] sm:$0xf] }
 0x17d   :  { %2337 = vmatpush.bf16.msra.mxu3 %v4186_v47  ;;  %v2084_v17 = vpop.f32.mrf.mxu3  ;;  %v2057_v47 = vadd.f32 %v5396_v8, %v2044_v28  ;;  %v4873_v20 = vld [vmem:[#allocation5 + $0x34] sm:$0xf] }
 0x17e   :  { %2795 = vmatpush.bf16.msra.mxu1 %v4362_v44  ;;  %2328 = vmatmul.bf16.vlgmr.msrb.gmra.mxu2 %v5349_v41  ;;  %v4836_v41 = vld [vmem:[#allocation2 + $0x70c] sm:$0xf]  ;;  %v4382_v44 = vor.u32 %v4897_v24, %v4379_v35  ;;  %v4885_v30 = vld [vmem:[#allocation5 + $0x94] sm:$0xf] }
 0x17f   :  { %v4138_v15 = vor.u32 %v4836_v41, %v4135_v6  ;;  %v4995_v36 = vpop.eup %4994  ;;  %v2070_v1 = vadd.f32 %v5404_v5, %v2057_v47  ;;  %v4366_v5 = vor.u32 %v4893_v55, %v4363_v57  ;;  %v4877_v41 = vld [vmem:[#allocation5 + $0x54] sm:$0xf]  ;;  %v4275_v24 = vld [vmem:[#allocation5 + $0x28] sm:$0xf0]  ;;  %v4334_v35 = vor.u32 %v4885_v30, %v4331_v25  ;;  %v4267_v47 = vld [vmem:[#allocation5 + $0x18] sm:$0xf0] }
 0x180   :  { %2781 = vmatpush.bf16.msrb.mxu0 %v4306_v49  ;;  %v2097_v11 = vpop.f32.mrf.mxu0  ;;  %v2378_v38 = vmul.f32 %v4995_v36, %v4251_v42  ;;  %v4868_v49 = vld [vmem:[#allocation5 + $0x4] sm:$0xf0]  ;;  %v4278_v36 = vor.u32 %v4871_v34, %v4275_v24  ;;  %v4441_v42 = vld [vmem:[#allocation5 + $0x170] sm:$0xf]  ;;  %v4910_v57 = vld [vmem:[#allocation5 + $0x154] sm:$0xf0] }
 0x181   :  { %2338 = vmatpush.bf16.msra.mxu3 %v4170_v54  ;;  %v2121_v39 = vpop.f32.mrf.mxu2  ;;  %v2083_v53 = vadd.f32 %v5411_v59, %v2070_v1  ;;  %v4318_v54 = vor.u32 %v4881_v52, %v4315_v62  ;;  %v4355_v59 = vld [vmem:[#allocation5 + $0xc8] sm:$0xf0]  ;;  %v4867_v62 = vld [vmem:[#allocation5 + $0x4] sm:$0xf]  ;;  %v4425_v55 = vld [vmem:[#allocation5 + $0x150] sm:$0xf] }
 0x182   :  { %2796 = vmatpush.bf16.msra.mxu1 %v4354_v45  ;;  %v4258_v45 = vor.u32 %v4868_v49, %v4257_v31  ;;  %v2382_v8 = vmul.f32 %v2378_v38, %v5402_v0  ;;  %v4299_v0 = vld [vmem:[#allocation5 + $0x58] sm:$0xf0]  ;;  %v4435_v24 = vld [vmem:[#allocation5 + $0x168] sm:$0xf0] }
 0x183   :  { %v4302_v9 = vor.u32 %v4877_v41, %v4299_v0 }
 0x184   :  { %2782 = vmatpush.bf16.msrb.mxu0 %v4298_v58  ;;  %v2096_v58 = vadd.f32 %v2095_v26, %v2083_v53  ;;  %v5422_v4 = vpack.c.bf16 %v2382_v8, %v2382_v8  ;;  %v4875_v26 = vld [vmem:[#allocation5 + $0x44] sm:$0xf]  ;;  %v4433_v53 = vld [vmem:[#allocation5 + $0x160] sm:$0xf] }
 0x185   :  { %2339 = vmatpush.bf16.msra.mxu3 %v4154_v60 }
 0x186   :  { %2797 = vmatpush.bf16.msra.mxu1 %v4346_v46  ;;  %v4891_v46 = vld [vmem:[#allocation5 + $0xc4] sm:$0xf]  ;;  %v2109_v60 = vadd.f32 %v5413_v3, %v2096_v58  ;;  %v4350_v3 = vor.u32 %v4889_v10, %v4347_v12  ;;  %v4401_v12 = vld [vmem:[#allocation5 + $0x120] sm:$0xf] }
 0x187   :  { %v4358_v6 = vor.u32 %v4891_v46, %v4355_v59 }
 0x188   :  { %2783 = vmatpush.bf16.msrb.mxu0 %v4290_v23  ;;  %v2122_v7 = vadd.f32 %v2121_v39, %v2109_v60  ;;  %v4883_v39 = vld [vmem:[#allocation5 + $0x84] sm:$0xf] }
 0x189   :  { %2340 = vmatpush.bf16.msra.mxu3 %v4138_v15  ;;  %v2123_v61 = vpop.f32.mrf.mxu2  ;;  %v4291_v15 = vld [vmem:[#allocation5 + $0x48] sm:$0xf0] }
 0x18a   :  { %2798 = vmatpush.bf16.msra.mxu1 %v4338_v13  ;;  %v4294_v17 = vor.u32 %v4875_v26, %v4291_v15  ;;  %v4426_v61 = vor.u32 %v4910_v57, %v4425_v55  ;;  %v4904_v26 = vld [vmem:[#allocation5 + $0x124] sm:$0xf0] }
 0x18b   :  { %v4402_v15 = vor.u32 %v4904_v26, %v4401_v12  ;;  %v4928_v12 = vld [vmem:[#allocation5 + $0x1e4] sm:$0xf0] }
 0x18c   :  { %2784 = vmatpush.bf16.msrb.mxu0 %v4282_v18  ;;  %2341 = vmatmul.bf16.vlgmr.msra.gmra.mxu3 %v5356_v37  ;;  %v4374_v37 = vor.u32 %v4895_v51, %v4371_v27  ;;  %v4887_v18 = vld [vmem:[#allocation5 + $0xa4] sm:$0xf] }
 0x18d   :  { %v4342_v56 = vor.u32 %v4887_v18, %v4339_v50  ;;  %v4902_v18 = vld [vmem:[#allocation5 + $0x114] sm:$0xf0] }
 0x18e   :  { %2799 = vmatpush.bf16.msra.mxu1 %v4330_v22 }
 0x18f   :  { %v2134_v23 = vpop.f32.mrf.mxu3 }
 0x190   :  { %2785 = vmatpush.bf16.msrb.mxu0 %v4274_v29  ;;  %v5426_v14 = vadd.f32 %v2134_v23, %v2122_v7  ;;  %v4286_v29 = vor.u32 %v4873_v20, %v4283_v21  ;;  %v4906_v7 = vld [vmem:[#allocation5 + $0x134] sm:$0xf0]  ;;  %v4385_v20 = vld [vmem:[#allocation5 + $0x100] sm:$0xf]  ;;  %v4900_v21 = vld [vmem:[#allocation5 + $0x104] sm:$0xf0] }
 0x192   :  { %2800 = vmatpush.bf16.msra.mxu1 %v4322_v40  ;;  %v5428_v13 = vpop.f32.mrf.mxu1  ;;  %v2347_v16 = vmin.f32 %v5426_v14, 20.0  ;;  %v4323_v40 = vld [vmem:[#allocation5 + $0x88] sm:$0xf0] }
 0x193   :  { %v4326_v49 = vor.u32 %v4883_v39, %v4323_v40  ;;  %v4427_v40 = vld [vmem:[#allocation5 + $0x158] sm:$0xf0] }
 0x194   :  { %2786 = vmatpush.bf16.msrb.mxu0 %v4266_v33  ;;  %v2352_v19 = vmul.f32 1.442695, %v2347_v16  ;;  %v4914_v33 = vld [vmem:[#allocation5 + $0x174] sm:$0xf0]  ;;  %v644_v16 = vperm.slane %v5382_v48, 2 }
 0x195   :  { %v4442_v51 = vor.u32 %v4914_v33, %v4441_v42  ;;  %v4911_v48 = vld [vmem:[#allocation5 + $0x164] sm:$0xf]  ;;  %v4419_v33 = vld [vmem:[#allocation5 + $0x148] sm:$0xf0] }
 0x196   :  { %2845 = vmatpush.bf16.msrb.mxu1 %v4382_v44  ;;  %4996 = vpow2.f32 %v2352_v19  ;;  %v4869_v44 = vld [vmem:[#allocation5 + $0x14] sm:$0xf] }
 0x197   :  { %v2136_v28 = vpop.f32.mrf.mxu3  ;;  %v4270_v52 = vor.u32 %v4869_v44, %v4267_v47  ;;  %2806 = vmatpush.bf16.msra.mxu2 %v4442_v51  ;;  %v4907_v47 = vld [vmem:[#allocation5 + $0x144] sm:$0xf] }
 0x198   :  { %2787 = vmatpush.bf16.msrb.mxu0 %v4258_v45  ;;  %v5431_v22 = vpop.f32.mrf.mxu0  ;;  %v4912_v45 = vld [vmem:[#allocation5 + $0x164] sm:$0xf0]  ;;  %v4913_v28 = vld [vmem:[#allocation5 + $0x174] sm:$0xf] }
 0x199   :  { %v2148_v19 = vadd.f32 %v5431_v22, %v644_v16  ;;  %v4909_v22 = vld [vmem:[#allocation5 + $0x154] sm:$0xf]  ;;  %v4926_v16 = vld [vmem:[#allocation5 + $0x1d4] sm:$0xf0] }
 0x19a   :  { %2846 = vmatpush.bf16.msrb.mxu1 %v4374_v37  ;;  %v2162_v32 = vpop.f32.mrf.mxu1  ;;  %v4259_v37 = vld [vmem:[#allocation5 + $0x8] sm:$0xf0]  ;;  %v4430_v44 = vor.u32 %v4909_v22, %v4427_v40 }
 0x19b   :  { %2788 = vmatmul.bf16.vlgmr.msrb.gmra.mxu0 %v5422_v4  ;;  %v4262_v58 = vor.u32 %v4867_v62, %v4259_v37  ;;  %v2161_v34 = vadd.f32 %v5428_v13, %v2148_v19 }
 0x19c   :  { %2832 = vmatpush.bf16.msra.mxu0 %v4318_v54  ;;  %v4997_v11 = vpop.eup %4996  ;;  %v4434_v54 = vor.u32 %v4912_v45, %v4433_v53  ;;  %v4903_v53 = vld [vmem:[#allocation5 + $0x124] sm:$0xf]  ;;  %v4403_v45 = vld [vmem:[#allocation5 + $0x128] sm:$0xf0] }
 0x19d   :  { %v2359_v31 = vadd.f32 1.0, %v4997_v11 }
 0x19e   :  { %2847 = vmatpush.bf16.msrb.mxu1 %v4366_v5  ;;  %2807 = vmatpush.bf16.msra.mxu2 %v4434_v54  ;;  %v4417_v5 = vld [vmem:[#allocation5 + $0x140] sm:$0xf]  ;;  %v4406_v54 = vor.u32 %v4903_v53, %v4403_v45  ;;  %v4927_v53 = vld [vmem:[#allocation5 + $0x1e4] sm:$0xf]  ;;  %v4499_v45 = vld [vmem:[#allocation5 + $0x1e8] sm:$0xf0] }
 0x19f   :  { %v2363_v1 = vmul.f32 %v2359_v31, %v2359_v31 }
 0x1a0   :  { %2833 = vmatpush.bf16.msra.mxu0 %v4310_v43  ;;  %v2149_v27 = vpop.f32.mrf.mxu0  ;;  %v4908_v43 = vld [vmem:[#allocation5 + $0x144] sm:$0xf0] }
 0x1a1   :  { %v5433_v38 = vpop.f32.mrf.mxu2  ;;  %v2371_v8 = vadd.f32 1.0, %v2363_v1  ;;  %v4252_v2 = vadd.f32 -1.0, %v2363_v1  ;;  %v4418_v59 = vor.u32 %v4908_v43, %v4417_v5  ;;  %v4905_v27 = vld [vmem:[#allocation5 + $0x134] sm:$0xf]  ;;  %v4411_v1 = vld [vmem:[#allocation5 + $0x138] sm:$0xf0] }
 0x1a2   :  { %2848 = vmatpush.bf16.msrb.mxu1 %v4358_v6  ;;  %2808 = vmatpush.bf16.msra.mxu2 %v4426_v61  ;;  %v4409_v6 = vld [vmem:[#allocation5 + $0x130] sm:$0xf]  ;;  %v4414_v62 = vor.u32 %v4905_v27, %v4411_v1  ;;  %v4395_v61 = vld [vmem:[#allocation5 + $0x118] sm:$0xf0]  ;;  %v4899_v5 = vld [vmem:[#allocation5 + $0x104] sm:$0xf] }
 0x1a3   :  { %4998 = vrcp.f32 %v2371_v8  ;;  %v4387_v43 = vld [vmem:[#allocation5 + $0x108] sm:$0xf0]  ;;  %v4507_v27 = vld [vmem:[#allocation5 + $0x1f8] sm:$0xf0] }
 0x1a4   :  { %2834 = vmatpush.bf16.msra.mxu0 %v4302_v9  ;;  %v4410_v9 = vor.u32 %v4906_v7, %v4409_v6 }
 0x1a6   :  { %2849 = vmatpush.bf16.msrb.mxu1 %v4350_v3  ;;  %2809 = vmatpush.bf16.msra.mxu2 %v4418_v59 }
 0x1a8   :  { %2835 = vmatpush.bf16.msra.mxu0 %v4294_v17 }
 0x1a9   :  { %v2175_v63 = vpop.f32.mrf.mxu2  ;;  %v4999_v46 = vpop.eup %4998 }
 0x1aa   :  { %2850 = vmatpush.bf16.msrb.mxu1 %v4342_v56  ;;  %v2379_v60 = vmul.f32 %v4999_v46, %v4252_v2  ;;  %2810 = vmatpush.bf16.msra.mxu2 %v4410_v9  ;;  %v4386_v56 = vor.u32 %v4900_v21, %v4385_v20  ;;  %v4505_v46 = vld [vmem:[#allocation5 + $0x1f0] sm:$0xf] }
 0x1ac   :  { %2836 = vmatpush.bf16.msra.mxu0 %v4286_v29  ;;  %v2383_v41 = vmul.f32 %v2379_v60, %v5426_v14  ;;  %v4443_v29 = vld [vmem:[#allocation5 + $0x178] sm:$0xf0]  ;;  %v4390_v60 = vor.u32 %v4899_v5, %v4387_v43  ;;  %v4923_v5 = vld [vmem:[#allocation5 + $0x1c4] sm:$0xf]  ;;  %v4483_v43 = vld [vmem:[#allocation5 + $0x1c8] sm:$0xf0] }
 0x1ad   :  { %v4446_v25 = vor.u32 %v4913_v28, %v4443_v29  ;;  %v4473_v29 = vld [vmem:[#allocation5 + $0x1b0] sm:$0xf] }
 0x1ae   :  { %2851 = vmatpush.bf16.msrb.mxu1 %v4334_v35  ;;  %v2387_v10 = vpack.c.bf16 %v2383_v41, %v2383_v41  ;;  %2811 = vmatpush.bf16.msra.mxu2 %v4402_v15  ;;  %v2174_v35 = vadd.f32 %v5433_v38, %v2161_v34  ;;  %v4930_v41 = vld [vmem:[#allocation5 + $0x1f4] sm:$0xf0] }
 0x1af   :  { %v2186_v0 = vpop.f32.mrf.mxu3  ;;  %v4506_v7 = vor.u32 %v4930_v41, %v4505_v46  ;;  %v4921_v41 = vld [vmem:[#allocation5 + $0x1b4] sm:$0xf] }
 0x1b0   :  { %2837 = vmatpush.bf16.msra.mxu0 %v4278_v36  ;;  %2801 = vmatmul.bf16.vlgmr.msra.gmra.mxu1 %v2387_v10  ;;  %v4438_v36 = vor.u32 %v4911_v48, %v4435_v24  ;;  %v2187_v39 = vadd.f32 %v2186_v0, %v2174_v35  ;;  %v4465_v48 = vld [vmem:[#allocation5 + $0x1a0] sm:$0xf]  ;;  %v4920_v24 = vld [vmem:[#allocation5 + $0x1a4] sm:$0xf0] }
 0x1b1   :  { %2819 = vmatpush.bf16.msrb.mxu3 %v4506_v7  ;;  %v4466_v35 = vor.u32 %v4920_v24, %v4465_v48  ;;  %v2454_v48 = vld [vmem:[%s5525_s6] sm:$0x3] }
 0x1b2   :  { %2852 = vmatpush.bf16.msrb.mxu1 %v4326_v49  ;;  %v2212_v23 = vpop.f32.mrf.mxu1  ;;  %v4422_v49 = vor.u32 %v4907_v47, %v4419_v33 }
 0x1b4   :  { %2838 = vmatpush.bf16.msra.mxu0 %v4270_v52 }
 0x1b7   :  { %v2188_v17 = vpop.f32.mrf.mxu3 }
 0x1b8   :  { %2839 = vmatpush.bf16.msra.mxu0 %v4262_v58  ;;  %v2199_v3 = vpop.f32.mrf.mxu0  ;;  %v4901_v58 = vld [vmem:[#allocation5 + $0x114] sm:$0xf] }
 0x1b9   :  { %v2200_v42 = vadd.f32 %v2199_v3, %v2187_v39  ;;  %v4398_v2 = vor.u32 %v4901_v58, %v4395_v61  ;;  %v4489_v3 = vld [vmem:[#allocation5 + $0x1d0] sm:$0xf]  ;;  %v5020_v39 = vld [vmem:[%s5523_s4] sm:$0xf]  ;;  %v4491_v58 = vld [vmem:[#allocation5 + $0x1d8] sm:$0xf0] }
 0x1ba   :  { %v2214_v50 = vpop.f32.mrf.mxu1  ;;  %v4490_v17 = vor.u32 %v4926_v16, %v4489_v3  ;;  %v645_v22 = vperm.slane %v5020_v39, 3  ;;  %v4917_v16 = vld [vmem:[#allocation5 + $0x194] sm:$0xf] }
 0x1bb   :  { %2840 = vmatmul.bf16.vlgmr.msra.gmra.mxu0 %v5422_v4  ;;  %v4393_v4 = vld [vmem:[#allocation5 + $0x110] sm:$0xf]  ;;  %v2213_v31 = vadd.f32 %v2212_v23, %v2200_v42  ;;  %v4481_v50 = vld [vmem:[#allocation5 + $0x1c0] sm:$0xf] }
 0x1bc   :  { %v4394_v14 = vor.u32 %v4902_v18, %v4393_v4  ;;  %v4457_v42 = vld [vmem:[#allocation5 + $0x190] sm:$0xf] }
 0x1be   :  { %2812 = vmatpush.bf16.msra.mxu2 %v4394_v14  ;;  %v4924_v14 = vld [vmem:[#allocation5 + $0x1c4] sm:$0xf0] }
 0x1bf   :  { %v4482_v20 = vor.u32 %v4924_v14, %v4481_v50  ;;  %v4451_v50 = vld [vmem:[#allocation5 + $0x188] sm:$0xf0] }
 0x1c0   :  { %v2201_v32 = vpop.f32.mrf.mxu0  ;;  %2853 = vmatmul.bf16.vlgmr.msrb.gmra.mxu1 %v2387_v10  ;;  %v4497_v10 = vld [vmem:[#allocation5 + $0x1e0] sm:$0xf] }
 0x1c1   :  { %v2225_v30 = vpop.f32.mrf.mxu2  ;;  %v4498_v15 = vor.u32 %v4928_v12, %v4497_v10  ;;  %v4467_v10 = vld [vmem:[#allocation5 + $0x1a8] sm:$0xf0] }
 0x1c2   :  { %2813 = vmatpush.bf16.msra.mxu2 %v4386_v56  ;;  %v2226_v13 = vadd.f32 %v2225_v30, %v2213_v31  ;;  %v4922_v30 = vld [vmem:[#allocation5 + $0x1b4] sm:$0xf0]  ;;  %v4449_v31 = vld [vmem:[#allocation5 + $0x180] sm:$0xf] }
 0x1c3   :  { %2820 = vmatpush.bf16.msrb.mxu3 %v4498_v15  ;;  %v4474_v32 = vor.u32 %v4922_v30, %v4473_v29 }
 0x1c6   :  { %2858 = vmatpush.bf16.msrb.mxu2 %v4446_v25 }
 0x1c7   :  { %2821 = vmatpush.bf16.msrb.mxu3 %v4490_v17  ;;  %v4459_v17 = vld [vmem:[#allocation5 + $0x198] sm:$0xf0] }
 0x1c9   :  { %v2227_v11 = vpop.f32.mrf.mxu2 }
 0x1ca   :  { %2859 = vmatpush.bf16.msrb.mxu2 %v4438_v36  ;;  %v4918_v11 = vld [vmem:[#allocation5 + $0x194] sm:$0xf0] }
 0x1cb   :  { %2822 = vmatpush.bf16.msrb.mxu3 %v4482_v20  ;;  %v4458_v47 = vor.u32 %v4918_v11, %v4457_v42  ;;  %v2457_v11 = vperm.slane %v2454_v48, 1 }
 0x1ce   :  { %2860 = vmatpush.bf16.msrb.mxu2 %v4430_v44 }
 0x1cf   :  { %v2238_v51 = vpop.f32.mrf.mxu3  ;;  %2823 = vmatpush.bf16.msrb.mxu3 %v4474_v32 }
 0x1d0   :  { %v2239_v38 = vadd.f32 %v2238_v51, %v2226_v13  ;;  %v4929_v51 = vld [vmem:[#allocation5 + $0x1f4] sm:$0xf] }
 0x1d2   :  { %2861 = vmatpush.bf16.msrb.mxu2 %v4422_v49  ;;  %v5441_v52 = vpop.f32.mrf.mxu1  ;;  %v2348_v37 = vmin.f32 %v2239_v38, 20.0  ;;  %v4916_v49 = vld [vmem:[#allocation5 + $0x184] sm:$0xf0] }
 0x1d3   :  { %2824 = vmatpush.bf16.msrb.mxu3 %v4466_v35  ;;  %v4450_v13 = vor.u32 %v4916_v49, %v4449_v31  ;;  %v2456_v35 = vperm.slane %v2454_v48, 0  ;;  %v4950_v48 = vld [vmem:[%s5528_s9 + $0x18] sm:$0xff] }
 0x1d4   :  { %v2354_v8 = vmul.f32 1.442695, %v2348_v37 }
 0x1d6   :  { %2862 = vmatpush.bf16.msrb.mxu2 %v4414_v62  ;;  %5000 = vpow2.f32 %v2354_v8 }
 0x1d7   :  { %v2240_v57 = vpop.f32.mrf.mxu3  ;;  %2825 = vmatpush.bf16.msrb.mxu3 %v4458_v47 }
 0x1d8   :  { %v2251_v55 = vpop.f32.mrf.mxu0 }
 0x1d9   :  { %v2252_v33 = vadd.f32 %v2251_v55, %v645_v22  ;;  %v4925_v55 = vld [vmem:[#allocation5 + $0x1d4] sm:$0xf] }
 0x1da   :  { %2863 = vmatpush.bf16.msrb.mxu2 %v4406_v54  ;;  %v2266_v63 = vpop.f32.mrf.mxu1  ;;  %v4502_v54 = vor.u32 %v4927_v53, %v4499_v45  ;;  %v4934_v53 = vld [vmem:[%s5526_s7 + $0x18] sm:$0xff] }
 0x1db   :  { %2826 = vmatpush.bf16.msrb.mxu3 %v4450_v13  ;;  %v2265_v37 = vadd.f32 %v5441_v52, %v2252_v33  ;;  %v4946_v45 = vld [vmem:[%s5526_s7 + $0x78] sm:$0xff] }
 0x1dc   :  { %v5001_v59 = vpop.eup %5000  ;;  %3051 = vmatpush.bf16.msra.mxu1 %v4946_v45 }
 0x1dd   :  { %v2360_v0 = vadd.f32 1.0, %v5001_v59  ;;  %v4486_v59 = vor.u32 %v4923_v5, %v4483_v43  ;;  %v4942_v43 = vld [vmem:[%s5526_s7 + $0x58] sm:$0xff] }
 0x1de   :  { %2864 = vmatpush.bf16.msrb.mxu2 %v4398_v2  ;;  %v4494_v2 = vor.u32 %v4925_v55, %v4491_v58  ;;  %v4944_v55 = vld [vmem:[%s5526_s7 + $0x68] sm:$0xff]  ;;  %v4931_v58 = vld [vmem:[%s5526_s7] sm:$0xff] }
 0x1df   :  { %v2364_v9 = vmul.f32 %v2360_v0, %v2360_v0  ;;  %v4475_v0 = vld [vmem:[#allocation5 + $0x1b8] sm:$0xf0] }
 0x1e0   :  { %v2253_v23 = vpop.f32.mrf.mxu0  ;;  %v4478_v7 = vor.u32 %v4921_v41, %v4475_v0  ;;  %v4940_v41 = vld [vmem:[%s5526_s7 + $0x48] sm:$0xff] }
 0x1e1   :  { %v2277_v6 = vpop.f32.mrf.mxu2  ;;  %v2372_v26 = vadd.f32 1.0, %v2364_v9  ;;  %v4253_v18 = vadd.f32 -1.0, %v2364_v9  ;;  %v4919_v9 = vld [vmem:[#allocation5 + $0x1a4] sm:$0xf] }
 0x1e2   :  { %2865 = vmatpush.bf16.msrb.mxu2 %v4390_v60  ;;  %v2278_v8 = vadd.f32 %v2277_v6, %v2265_v37  ;;  %v4935_v37 = vld [vmem:[%s5526_s7 + $0x20] sm:$0xff] }
 0x1e3   :  { %5002 = vrcp.f32 %v2372_v26  ;;  %v4470_v26 = vor.u32 %v4919_v9, %v4467_v10 }
 0x1e9   :  { %v2279_v4 = vpop.f32.mrf.mxu2  ;;  %v5003_v19 = vpop.eup %5002 }
 0x1ea   :  { %v2380_v21 = vmul.f32 %v5003_v19, %v4253_v18  ;;  %v4462_v4 = vor.u32 %v4917_v16, %v4459_v17  ;;  %v4915_v18 = vld [vmem:[#allocation5 + $0x184] sm:$0xf] }
 0x1eb   :  { %v4454_v19 = vor.u32 %v4915_v18, %v4451_v50 }
 0x1ec   :  { %v2384_v56 = vmul.f32 %v2380_v21, %v2239_v38  ;;  %v4510_v38 = vor.u32 %v4929_v51, %v4507_v27 }
 0x1ee   :  { %v2388_v34 = vpack.c.bf16 %v2384_v56, %v2384_v56  ;;  %2871 = vmatpush.bf16.msra.mxu3 %v4510_v38  ;;  %v4937_v38 = vld [vmem:[%s5526_s7 + $0x30] sm:$0xff] }
 0x1ef   :  { %v2290_v28 = vpop.f32.mrf.mxu3 }
 0x1f0   :  { %2814 = vmatmul.bf16.vlgmr.msra.gmra.mxu2 %v2388_v34  ;;  %v2291_v57 = vadd.f32 %v2290_v28, %v2278_v8  ;;  %v4933_v8 = vld [vmem:[%s5526_s7 + $0x10] sm:$0xff] }
 0x1f1   :  { %3119 = vmatpush.bf16.msra.mxu2 %v4950_v48 }
 0x1f2   :  { %v2316_v25 = vpop.f32.mrf.mxu1  ;;  %2872 = vmatpush.bf16.msra.mxu3 %v4502_v54  ;;  %v4945_v54 = vld [vmem:[%s5526_s7 + $0x70] sm:$0xff] }
 0x1f3   :  { %3052 = vmatpush.bf16.msra.mxu1 %v4945_v54 }
 0x1f6   :  { %2873 = vmatpush.bf16.msra.mxu3 %v4494_v2 }
 0x1f7   :  { %v2292_v40 = vpop.f32.mrf.mxu3  ;;  %3053 = vmatpush.bf16.msra.mxu1 %v4944_v55 }
 0x1f8   :  { %v2303_v36 = vpop.f32.mrf.mxu0 }
 0x1f9   :  { %v2304_v61 = vadd.f32 %v2303_v36, %v2291_v57  ;;  %v4932_v57 = vld [vmem:[%s5526_s7 + $0x8] sm:$0xff] }
 0x1fa   :  { %v2318_v44 = vpop.f32.mrf.mxu1  ;;  %2874 = vmatpush.bf16.msra.mxu3 %v4486_v59 }
 0x1fb   :  { %v2317_v46 = vadd.f32 %v2316_v25, %v2304_v61  ;;  %v4943_v61 = vld [vmem:[%s5526_s7 + $0x60] sm:$0xff] }
 0x1fc   :  { %3054 = vmatpush.bf16.msra.mxu1 %v4943_v61 }
 0x1fe   :  { %2875 = vmatpush.bf16.msra.mxu3 %v4478_v7 }
 0x200   :  { %v2305_v62 = vpop.f32.mrf.mxu0  ;;  %2866 = vmatmul.bf16.vlgmr.msrb.gmra.mxu2 %v2388_v34  ;;  %3055 = vmatpush.bf16.msra.mxu1 %v4942_v43 }
 0x201   :  { %v2329_v1 = vpop.f32.mrf.mxu2  ;;  %v4936_v62 = vld [vmem:[%s5526_s7 + $0x28] sm:$0xff] }
 0x202   :  { %v2330_v60 = vadd.f32 %v2329_v1, %v2317_v46  ;;  %2876 = vmatpush.bf16.msra.mxu3 %v4470_v26  ;;  %v4938_v1 = vld [vmem:[%s5526_s7 + $0x38] sm:$0xff] }
 0x203   :  { %3038 = vmatpush.bf16.msrb.mxu0 %v4938_v1 }
 0x206   :  { %2877 = vmatpush.bf16.msra.mxu3 %v4462_v4 }
 0x207   :  { %3039 = vmatpush.bf16.msrb.mxu0 %v4937_v38 }
 0x209   :  { %v2331_v63 = vpop.f32.mrf.mxu2 }
 0x20a   :  { %2878 = vmatpush.bf16.msra.mxu3 %v4454_v19 }
 0x20b   :  { %3040 = vmatpush.bf16.msrb.mxu0 %v4936_v62 }
 0x20f   :  { %v2342_v52 = vpop.f32.mrf.mxu3  ;;  %3041 = vmatpush.bf16.msrb.mxu0 %v4935_v37 }
 0x210   :  { %v2343_v6 = vadd.f32 %v2342_v52, %v2330_v60  ;;  %v4941_v60 = vld [vmem:[%s5526_s7 + $0x50] sm:$0xff] }
 0x211   :  { %3056 = vmatpush.bf16.msra.mxu1 %v4941_v60 }
 0x212   :  { %v2349_v23 = vmin.f32 %v2343_v6, 20.0 }
 0x213   :  { %3042 = vmatpush.bf16.msrb.mxu0 %v4934_v53  ;;  %v4959_v53 = vld [vmem:[%s5529_s10] ss:$0 sm:$0xff] }
 0x214   :  { %v2356_v12 = vmul.f32 1.442695, %v2349_v23 }
 0x215   :  { %3057 = vmatpush.bf16.msra.mxu1 %v4940_v41 }
 0x216   :  { %5004 = vpow2.f32 %v2356_v12 }
 0x217   :  { %v2344_v3 = vpop.f32.mrf.mxu3  ;;  %3043 = vmatpush.bf16.msrb.mxu0 %v4933_v8 }
 0x218   :  { %v2789_v15 = vpop.f32.mrf.mxu0 }
 0x219   :  { %v2790_v36 = vadd.f32 %v2789_v15, %v2456_v35 }
 0x21b   :  { %3044 = vmatpush.bf16.msrb.mxu0 %v4932_v57 }
 0x21c   :  { %v5005_v14 = vpop.eup %5004 }
 0x21d   :  { %v2361_v20 = vadd.f32 1.0, %v5005_v14 }
 0x21f   :  { %v2365_v56 = vmul.f32 %v2361_v20, %v2361_v20  ;;  %3045 = vmatpush.bf16.msrb.mxu0 %v4931_v58 }
 0x220   :  { %v2791_v21 = vpop.f32.mrf.mxu0 }
 0x221   :  { %v2373_v28 = vadd.f32 1.0, %v2365_v56  ;;  %v4254_v29 = vadd.f32 -1.0, %v2365_v56 }
 0x223   :  { %5006 = vrcp.f32 %v2373_v28 }
 0x229   :  { %v5007_v30 = vpop.eup %5006 }
 0x22a   :  { %v2381_v25 = vmul.f32 %v5007_v30, %v4254_v29 }
 0x22c   :  { %v2385_v32 = vmul.f32 %v2381_v25, %v2343_v6  ;;  %v4939_v6 = vld [vmem:[%s5526_s7 + $0x40] sm:$0xff] }
 0x22d   :  { %v2802_v39 = vpop.f32.mrf.mxu1  ;;  %3058 = vmatpush.bf16.msra.mxu1 %v4939_v6 }
 0x22e   :  { %v2389_v34 = vpack.c.bf16 %v2385_v32, %v2385_v32  ;;  %v2803_v22 = vadd.f32 %v2802_v39, %v2790_v36  ;;  %v4948_v36 = vld [vmem:[%s5528_s9 + $0x8] sm:$0xff]  ;;  %v4958_v39 = vld [vmem:[%s5527_s8] ss:$0 sm:$0xff] }
 0x230   :  { %2827 = vmatmul.bf16.vlgmr.msrb.gmra.mxu3 %v2389_v34 }
 0x235   :  { %v2804_v42 = vpop.f32.mrf.mxu1 }
 0x238   :  { %v2841_v24 = vpop.f32.mrf.mxu0 }
 0x239   :  { %v2842_v44 = vadd.f32 %v2841_v24, %v2457_v11  ;;  %v4949_v24 = vld [vmem:[%s5528_s9 + $0x10] sm:$0xff] }
 0x23a   :  { %3120 = vmatpush.bf16.msra.mxu2 %v4949_v24 }
 0x23d   :  { %v2854_v47 = vpop.f32.mrf.mxu1 }
 0x23e   :  { %v2855_v33 = vadd.f32 %v2854_v47, %v2842_v44  ;;  %3121 = vmatpush.bf16.msra.mxu2 %v4948_v36 }
 0x240   :  { %v2843_v40 = vpop.f32.mrf.mxu0  ;;  %2879 = vmatmul.bf16.vlgmr.msra.gmra.mxu3 %v2389_v34 }
 0x245   :  { %v2856_v31 = vpop.f32.mrf.mxu1 }
 0x273   :  { %v2815_v49 = vpop.f32.mrf.mxu2 }
 0x274   :  { %v2816_v63 = vadd.f32 %v2815_v49, %v2803_v22  ;;  %v4947_v22 = vld [vmem:[%s5528_s9] sm:$0xff] }
 0x275   :  { %3122 = vmatpush.bf16.msra.mxu2 %v4947_v22 }
 0x27b   :  { %v2817_v13 = vpop.f32.mrf.mxu2 }
 0x283   :  { %v2867_v51 = vpop.f32.mrf.mxu2 }
 0x284   :  { %v2868_v23 = vadd.f32 %v2867_v51, %v2855_v33 }
 0x28b   :  { %v2869_v27 = vpop.f32.mrf.mxu2 }
 0x2b3   :  { %v2828_v2 = vpop.f32.mrf.mxu3 }
 0x2b4   :  { %v2829_v5 = vadd.f32 %v2828_v2, %v2816_v63 }
 0x2b6   :  { %v2884_v46 = vmin.f32 %v2829_v5, 20.0 }
 0x2b8   :  { %v2886_v59 = vmul.f32 1.442695, %v2884_v46 }
 0x2ba   :  { %5008 = vpow2.f32 %v2886_v59 }
 0x2bb   :  { %v2830_v52 = vpop.f32.mrf.mxu3 }
 0x2c0   :  { %v5009_v0 = vpop.eup %5008 }
 0x2c1   :  { %v2890_v7 = vadd.f32 1.0, %v5009_v0 }
 0x2c3   :  { %v2892_v9 = vmul.f32 %v2890_v7, %v2890_v7  ;;  %v2880_v10 = vpop.f32.mrf.mxu3 }
 0x2c4   :  { %v2881_v12 = vadd.f32 %v2880_v10, %v2868_v23 }
 0x2c5   :  { %v2896_v26 = vadd.f32 1.0, %v2892_v9  ;;  %v4511_v17 = vadd.f32 -1.0, %v2892_v9 }
 0x2c6   :  { %v2885_v15 = vmin.f32 %v2881_v12, 20.0 }
 0x2c7   :  { %5010 = vrcp.f32 %v2896_v26 }
 0x2c8   :  { %v2888_v3 = vmul.f32 1.442695, %v2885_v15 }
 0x2ca   :  { %5012 = vpow2.f32 %v2888_v3 }
 0x2cb   :  { %v2882_v16 = vpop.f32.mrf.mxu3 }
 0x2cd   :  { %v5011_v4 = vpop.eup %5010 }
 0x2ce   :  { %v2900_v18 = vmul.f32 %v5011_v4, %v4511_v17 }
 0x2d0   :  { %v5013_v50 = vpop.eup %5012  ;;  %v2902_v14 = vmul.f32 %v2900_v18, %v2829_v5 }
 0x2d1   :  { %v2891_v19 = vadd.f32 1.0, %v5013_v50 }
 0x2d2   :  { %v2904_v20 = vpack.c.bf16 %v2902_v14, %v2902_v14 }
 0x2d3   :  { %v2893_v21 = vmul.f32 %v2891_v19, %v2891_v19 }
 0x2d4   :  { %3046 = vmatmul.bf16.vlgmr.msrb.gmra.mxu0 %v2904_v20 }
 0x2d5   :  { %v2897_v56 = vadd.f32 1.0, %v2893_v21  ;;  %v4512_v28 = vadd.f32 -1.0, %v2893_v21 }
 0x2d7   :  { %5014 = vrcp.f32 %v2897_v56 }
 0x2dd   :  { %v5015_v29 = vpop.eup %5014 }
 0x2de   :  { %v2901_v30 = vmul.f32 %v5015_v29, %v4512_v28 }
 0x2e0   :  { %v2903_v25 = vmul.f32 %v2901_v30, %v2881_v12 }
 0x2e2   :  { %v2905_v32 = vpack.c.bf16 %v2903_v25, %v2903_v25 }
 0x2e4   :  { %3059 = vmatmul.bf16.vlgmr.msra.gmra.mxu1 %v2905_v32 }
 0x351   :  { %v3047_v34 = vpop.f32.mrf.mxu0 }
 0x352   :  { %v3048_v40 = vadd.f32 %v4958_v39, %v3047_v34 }
 0x359   :  { %v3049_v35 = vpop.f32.mrf.mxu0 }
 0x361   :  { %v3060_v42 = vpop.f32.mrf.mxu1 }
 0x362   :  { %v3061_v11 = vadd.f32 %v3060_v42, %v3048_v40 }
 0x364   :  { %v3064_v44 = vmin.f32 %v3061_v11, 20.0 }
 0x366   :  { %v3065_v47 = vmul.f32 1.442695, %v3064_v44 }
 0x368   :  { %5016 = vpow2.f32 %v3065_v47 }
 0x369   :  { %v3062_v33 = vpop.f32.mrf.mxu1 }
 0x36e   :  { %v5017_v31 = vpop.eup %5016 }
 0x36f   :  { %v3067_v49 = vadd.f32 1.0, %v5017_v31 }
 0x371   :  { %v3068_v13 = vmul.f32 %v3067_v49, %v3067_v49 }
 0x373   :  { %v3070_v51 = vadd.f32 1.0, %v3068_v13  ;;  %v4577_v27 = vadd.f32 -1.0, %v3068_v13 }
 0x375   :  { %5018 = vrcp.f32 %v3070_v51 }
 0x37b   :  { %v5019_v1 = vpop.eup %5018 }
 0x37c   :  { %v3072_v38 = vmul.f32 %v5019_v1, %v4577_v27 }
 0x37e   :  { %v3073_v62 = vmul.f32 %v3072_v38, %v3061_v11 }
 0x380   :  { %v3074_v37 = vpack.c.bf16 %v3073_v62, %v3073_v62 }
 0x382   :  { %4594 = vmatmul.msk.bf16.vlgmr.msra.gmra.mxu2 %vm3111_vm1, %v3074_v37 }
 0x405   :  { %v3124_v45 = vpop.f32.mrf.mxu2 }
 0x406   :  { %v3125_v8 = vadd.f32 %v4959_v53, %v3124_v45 }
 0x408   :  { %3128 = vst [vmem:[#allocation7] sm:$0xff] %v3125_v8 }
 0x409   :  { %3139 = dma.vmem_to_hbm [thread:$0]  %s3135_s30, 128, %s3137_s12, [#allocation4]  }
 0x40d   :  { %v3126_v54 = vpop.f32.mrf.mxu2 }
 0x40e   :  { %5097 = dma.done.wait [#allocation4], 128  }
 0x40f   :  { %5098 = vsyncadd [#allocation4], 4294967168 }
 0x410   :  { %3144 = vsyncpa [#allocation3], 1 }
 0x411   :  { %3145 = vsyncpa [#allocation6], 1 }
 0x412   :  { %3146 = vsyncpa [#allocation4], 1 }

</bundles_post_ra>
